<compile_context>
chip_gen: v7x
topology: tpu7x:2x2x1
jax: 0.10.0
libtpu: 0.0.40
codegen_flags: <defaults>
</compile_context>

<pallas_src>
import functools

import jax
import jax.numpy as jnp
import numpy as np
from jax.experimental import pallas as pl
from jax.experimental.pallas import tpu as pltpu

_LANE = 128


def _default_vmem_limit_bytes():
    """~75% of physical VMEM (leaves compiler-scratch headroom on every gen)."""
    try:
        cap = int(pltpu.get_tpu_info().vmem_capacity_bytes)
        return max(32 * 1024 * 1024, (cap * 3) // 4)
    except Exception:
        return 64 * 1024 * 1024  # previous known-good fallback


def _im2ht_kernel(contrib_ref, rep_ref, qcol_ref, vsrc_ref, vdst_ref, vol_ref,
                  *, hw_tile):
    """One (hw-tile, vote-tile) grid step.

    contrib_ref: (BC, TK)   precomputed 0.5*(feats[isrc] + feats[idst]) votes.
    rep_ref:     (BCD, BC)  constant 0/1 row-replication matrix (resident).
    qcol_ref:    (BCD, 1)   i32, depth bin of each accumulator row (resident).
    vsrc_ref:    (TK, 1)    i32 voxels_src column (padded votes carry -1).
    vdst_ref:    (1, TK)    i32 voxels_dst row    (padded votes carry -1).
    vol_ref:     (BCD, hw_tile) f32 accumulator block, resident across the
                 vote (reduction) grid axis.
    """
    k = pl.program_id(1)

    @pl.when(k == 0)
    def _():
        vol_ref[...] = jnp.zeros_like(vol_ref)

    contrib = contrib_ref[...]                    # (BC, TK)  compute dtype
    rep = rep_ref[...]                            # (BCD, BC) compute dtype
    qcol = qcol_ref[...]                          # (BCD, 1)  i32
    vsrc = vsrc_ref[...]                          # (TK, 1)   i32
    vdst = vdst_ref[...]                          # (1, TK)   i32

    cdt = contrib.dtype
    one = jnp.asarray(1.0, cdt)
    zero = jnp.asarray(0.0, cdt)

    BCD = vol_ref.shape[0]
    TK = contrib.shape[1]

    # Expand rows bc -> (bc, q) with the tiny constant 0/1 matmul (negligible
    # next to the scatter matmul; avoids an in-kernel sublane relayout).
    g_exp = jnp.dot(rep, contrib,
                    preferred_element_type=jnp.float32).astype(cdt)   # (BCD, TK)

    # Depth mask: S_dst[(bc,q), j] = [voxels_dst[j] == q].
    s_dst = jnp.where(qcol == vdst, one, zero)                        # (BCD, TK)

    # hw one-hot for this tile, built pre-transposed (hw bin on the lane dim):
    # S_srcT[j, p] = [voxels_src[j] == hw_off + p].
    hw_off = pl.program_id(0) * hw_tile
    hw_iota = jax.lax.broadcasted_iota(jnp.int32, (TK, hw_tile), 1) + hw_off
    s_srcT = jnp.where(hw_iota == vsrc, one, zero)                    # (TK, hw_tile)

    # Contract the vote dim on the MXU in plain (M,K)x(K,N) form.
    tmp = g_exp * s_dst                                               # (BCD, TK)
    vol_ref[...] += jnp.dot(tmp, s_srcT,
                            preferred_element_type=jnp.float32)       # (BCD, hw_tile)


def im2ht_forward(feats_src_dst, voxels_src, voxels_dst, idxs_src, idxs_dst,
                  h, w, d, *, vote_tile=512, hw_tile=None):
    """Pallas equivalent of IM2HT.forward (inference semantics).

    Out-of-range indices are silently dropped (the one-hot compare never
    matches) rather than faulting like the CUDA scatter would.
    """
    B, C, L = feats_src_dst.shape
    M = int(idxs_src.shape[0])
    HW = h * w
    BC = B * C
    BCD = BC * d

    out_dtype = feats_src_dst.dtype
    # bf16 feats keep bf16 MXU operands (2x path); everything else runs f32.
    cdt = jnp.bfloat16 if feats_src_dst.dtype == jnp.bfloat16 else jnp.float32

    # ---- hoist the vote-only (k-only) gather out of the kernel --------------
    feats2 = feats_src_dst.reshape(BC, L).astype(cdt)
    isrc = jnp.asarray(idxs_src).reshape(-1).astype(jnp.int32)
    idst = jnp.asarray(idxs_dst).reshape(-1).astype(jnp.int32)
    contrib = (0.5 * (jnp.take(feats2, isrc, axis=1)
                      + jnp.take(feats2, idst, axis=1))).astype(cdt)   # (BC, M)

    # ---- pad the vote stream to a multiple of vote_tile ----------------------
    num_k = max(1, -(-M // vote_tile))
    M_pad = num_k * vote_tile
    pad = M_pad - M
    if pad:
        contrib = jnp.pad(contrib, ((0, 0), (0, pad)))

    def prep(x):
        x = jnp.asarray(x).reshape(-1).astype(jnp.int32)
        if pad:
            x = jnp.concatenate([x, jnp.full((pad,), -1, jnp.int32)])
        return x

    vsrc_col = prep(voxels_src).reshape(M_pad, 1)   # column -> transposed one-hot
    vdst_row = prep(voxels_dst).reshape(1, M_pad)   # row    -> depth mask

    # ---- constant resident inputs (built once, never rebuilt per step) -------
    rep = (jnp.arange(BCD, dtype=jnp.int32)[:, None] // d
           == jnp.arange(BC, dtype=jnp.int32)[None, :]).astype(cdt)    # (BCD, BC)
    q_col = (jnp.arange(BCD, dtype=jnp.int32) % d).reshape(BCD, 1)     # (BCD, 1)

    # ---- VMEM budget + hw tiling ---------------------------------------------
    vmem_limit = _default_vmem_limit_bytes()

    hw_pad_min = max(_LANE, -(-HW // _LANE) * _LANE)   # HW rounded up to lanes
    if hw_tile is None:
        if hw_pad_min <= _LANE:
            hw_tile = _LANE
        else:
            # at least two hw tiles (v7x two-TensorCore split), <=512 lanes wide
            hw_tile = min(512, max(_LANE, (hw_pad_min // 2) // _LANE * _LANE))
    else:
        hw_tile = max(_LANE, -(-hw_tile // _LANE) * _LANE)   # lane-align
    hw_tile = min(hw_tile, hw_pad_min)
    # keep the double-buffered f32 accumulator block within ~half the budget
    max_hw_tile = max(_LANE, (vmem_limit // 2) // (2 * BCD * 4) // _LANE * _LANE)
    hw_tile = min(hw_tile, max_hw_tile)

    num_hw = -(-HW // hw_tile)
    HW_pad = num_hw * hw_tile

    grid = (num_hw, num_k)   # (parallel hw axis, reduction vote axis last)

    vol = pl.pallas_call(
        functools.partial(_im2ht_kernel, hw_tile=hw_tile),
        out_shape=jax.ShapeDtypeStruct((BCD, HW_pad), jnp.float32),
        grid_spec=pltpu.PrefetchScalarGridSpec(
            num_scalar_prefetch=0,
            grid=grid,
            in_specs=[
                pl.BlockSpec((BC, vote_tile), lambda i, k: (0, k)),   # contrib
                pl.BlockSpec((BCD, BC), lambda i, k: (0, 0)),         # rep (resident)
                pl.BlockSpec((BCD, 1), lambda i, k: (0, 0)),          # q_col (resident)
                pl.BlockSpec((vote_tile, 1), lambda i, k: (k, 0)),    # voxels_src col
                pl.BlockSpec((1, vote_tile), lambda i, k: (0, k)),    # voxels_dst row
            ],
            out_specs=pl.BlockSpec((BCD, hw_tile), lambda i, k: (0, i)),
        ),
        compiler_params=pltpu.CompilerParams(
            dimension_semantics=("parallel", "arbitrary"),
            vmem_limit_bytes=vmem_limit),
    )(contrib, rep, q_col, vsrc_col, vdst_row)

    # Wrapper-side glue: drop hw padding, un-fold batch/channel/depth, permute.
    vol = vol[:, :HW].reshape(B, C, d, h, w)
    vol = jnp.transpose(vol, (0, 1, 3, 4, 2))      # (B, C, h, w, d)
    return vol.astype(out_dtype)


def im2ht_reference(feats, voxels_src, voxels_dst, idxs_src, idxs_dst, h, w, d):
    """Pure-JAX reference of the assumed im2ht_forward semantics (exact f32)."""
    B, C, L = feats.shape
    V = h * w * d
    contrib = 0.5 * (feats[:, :, idxs_src] + feats[:, :, idxs_dst])  # (B, C, M)
    vflat = voxels_src * d + voxels_dst                              # (M,)
    vol = jnp.zeros((B, C, V), jnp.float32).at[:, :, vflat].add(
        contrib.astype(jnp.float32))
    return vol.reshape(B, C, h, w, d)


if __name__ == "__main__":
    key = jax.random.PRNGKey(0)

    B, C = 2, 8
    L = 128                    # flattened src+dst feature locations
    h, w, d = 16, 16, 4        # Hough volume dims (h*w = 256 -> 2 hw tiles)
    M = 700                    # votes (padded to 1024 -> 2 vote tiles of 512)

    k1, k2, k3, k4, k5 = jax.random.split(key, 5)
    feats_src_dst = jax.random.normal(k1, (B, C, L), dtype=jnp.float32)
    idxs_src = jax.random.randint(k2, (M,), 0, L, dtype=jnp.int32)
    idxs_dst = jax.random.randint(k3, (M,), 0, L, dtype=jnp.int32)
    voxels_src = jax.random.randint(k4, (M,), 0, h * w, dtype=jnp.int32)
    voxels_dst = jax.random.randint(k5, (M,), 0, d, dtype=jnp.int32)

    vol = im2ht_forward(feats_src_dst, voxels_src, voxels_dst,
                        idxs_src, idxs_dst, h, w, d)
    vol = jax.block_until_ready(vol)

    ref = im2ht_reference(feats_src_dst, voxels_src, voxels_dst,
                          idxs_src, idxs_dst, h, w, d)
    np.testing.assert_allclose(np.asarray(vol), np.asarray(ref),
                               rtol=1e-4, atol=1e-4)
    print("KERNEL_OK")
</pallas_src>

<mosaic_0001>
module attributes {stable_mosaic.version = 11 : i64} {
  func.func @_im2ht_kernel(%arg0: i32, %arg1: i32, %arg2: memref<16x512xf32, #tpu.memory_space<vmem>>, %arg3: memref<64x16xf32, #tpu.memory_space<vmem>>, %arg4: memref<64x1xi32, #tpu.memory_space<vmem>>, %arg5: memref<512x1xi32, #tpu.memory_space<vmem>>, %arg6: memref<1x512xi32, #tpu.memory_space<vmem>>, %arg7: memref<64x128xf32, #tpu.memory_space<vmem>>) attributes {dimension_semantics = [#tpu.dimension_semantics<parallel>, #tpu.dimension_semantics<arbitrary>], iteration_bounds = array<i64: 2, 2>, scalar_prefetch = 0 : i64, scratch_operands = 0 : i64, tpu.core_type = #tpu.core_type<tc>, window_params = [{transform_indices = @transform_0, window_bounds = array<i64: 16, 512>}, {pipeline_mode = #tpu.pipeline_mode<synchronous>, transform_indices = @transform_1, window_bounds = array<i64: 64, 16>}, {pipeline_mode = #tpu.pipeline_mode<synchronous>, transform_indices = @transform_2, window_bounds = array<i64: 64, 1>}, {transform_indices = @transform_3, window_bounds = array<i64: 512, 1>}, {transform_indices = @transform_4, window_bounds = array<i64: 1, 512>}, {transform_indices = @transform_5, window_bounds = array<i64: 64, 128>}]} {
    %c0_i32 = arith.constant 0 : i32
    %0 = arith.cmpi eq, %arg1, %c0_i32 : i32
    %1 = arith.extui %0 : i1 to i32
    %c0_i32_0 = arith.constant 0 : i32
    %2 = arith.cmpi ne, %1, %c0_i32_0 : i32
    scf.if %2 {
      %cst_19 = arith.constant 0.000000e+00 : f32
      %29 = vector.broadcast %cst_19 : f32 to vector<64x128xf32>
      %c0_20 = arith.constant 0 : index
      %c0_21 = arith.constant 0 : index
      %30 = vector.load %arg7[%c0_20, %c0_21] : memref<64x128xf32, #tpu.memory_space<vmem>>, vector<64x128xf32>
      tpu.vector_store %arg7[%c0_20, %c0_21], %29 {strides = array<i32>} : memref<64x128xf32, #tpu.memory_space<vmem>>, vector<64x128xf32>,
    } else {
    }
    %c0 = arith.constant 0 : index
    %c0_1 = arith.constant 0 : index
    %3 = vector.load %arg2[%c0, %c0_1] : memref<16x512xf32, #tpu.memory_space<vmem>>, vector<16x512xf32>
    %c0_2 = arith.constant 0 : index
    %c0_3 = arith.constant 0 : index
    %4 = vector.load %arg3[%c0_2, %c0_3] : memref<64x16xf32, #tpu.memory_space<vmem>>, vector<64x16xf32>
    %c0_4 = arith.constant 0 : index
    %c0_5 = arith.constant 0 : index
    %5 = vector.load %arg4[%c0_4, %c0_5] : memref<64x1xi32, #tpu.memory_space<vmem>>, vector<64x1xi32>
    %c0_6 = arith.constant 0 : index
    %c0_7 = arith.constant 0 : index
    %6 = vector.load %arg5[%c0_6, %c0_7] : memref<512x1xi32, #tpu.memory_space<vmem>>, vector<512x1xi32>
    %c0_8 = arith.constant 0 : index
    %c0_9 = arith.constant 0 : index
    %7 = vector.load %arg6[%c0_8, %c0_9] : memref<1x512xi32, #tpu.memory_space<vmem>>, vector<1x512xi32>
    %cst = arith.constant dense<0.000000e+00> : vector<64x512xf32>
    %8 = tpu.matmul %4, %3, %cst {dimension_numbers = #tpu.dot_dimension_numbers<[1], [0], [0], [1], [0, 0, 1, 1], [], []>} : vector<64x16xf32>, vector<16x512xf32>, vector<64x512xf32> -> vector<64x512xf32>
    %9 = vector.broadcast %5 : vector<64x1xi32> to vector<64x512xi32>
    %10 = vector.broadcast %7 : vector<1x512xi32> to vector<64x512xi32>
    %11 = arith.cmpi eq, %9, %10 : vector<64x512xi32>
    %cst_10 = arith.constant 1.000000e+00 : f32
    %cst_11 = arith.constant 0.000000e+00 : f32
    %12 = vector.broadcast %cst_10 : f32 to vector<64x512xf32>
    %13 = vector.broadcast %cst_11 : f32 to vector<64x512xf32>
    %14 = arith.select %11, %12, %13 : vector<64x512xi1>, vector<64x512xf32>
    %c128_i32 = arith.constant 128 : i32
    %15 = arith.muli %arg0, %c128_i32 : i32
    %16 = tpu.iota {dimensions = array<i32: 1>} : vector<512x128xi32>
    %17 = vector.broadcast %15 : i32 to vector<512x128xi32>
    %18 = arith.addi %16, %17 : vector<512x128xi32>
    %19 = vector.broadcast %6 : vector<512x1xi32> to vector<512x128xi32>
    %20 = arith.cmpi eq, %18, %19 : vector<512x128xi32>
    %cst_12 = arith.constant 1.000000e+00 : f32
    %cst_13 = arith.constant 0.000000e+00 : f32
    %21 = vector.broadcast %cst_12 : f32 to vector<512x128xf32>
    %22 = vector.broadcast %cst_13 : f32 to vector<512x128xf32>
    %23 = arith.select %20, %21, %22 : vector<512x128xi1>, vector<512x128xf32>
    %24 = arith.mulf %8, %14 : vector<64x512xf32>
    %c0_14 = arith.constant 0 : index
    %c0_15 = arith.constant 0 : index
    %25 = vector.load %arg7[%c0_14, %c0_15] : memref<64x128xf32, #tpu.memory_space<vmem>>, vector<64x128xf32>
    %cst_16 = arith.constant dense<0.000000e+00> : vector<64x128xf32>
    %26 = tpu.matmul %24, %23, %cst_16 {dimension_numbers = #tpu.dot_dimension_numbers<[1], [0], [0], [1], [0, 0, 1, 1], [], []>} : vector<64x512xf32>, vector<512x128xf32>, vector<64x128xf32> -> vector<64x128xf32>
    %27 = arith.addf %25, %26 : vector<64x128xf32>
    %c0_17 = arith.constant 0 : index
    %c0_18 = arith.constant 0 : index
    %28 = vector.load %arg7[%c0_17, %c0_18] : memref<64x128xf32, #tpu.memory_space<vmem>>, vector<64x128xf32>
    tpu.vector_store %arg7[%c0_17, %c0_18], %27 {strides = array<i32>} : memref<64x128xf32, #tpu.memory_space<vmem>>, vector<64x128xf32>,
    return
  }
  func.func @transform_0(%arg0: i32, %arg1: i32) -> (i32, i32) {
    %c0_i32 = arith.constant 0 : i32
    %c0_i32_0 = arith.constant 0 : i32
    return %c0_i32, %arg1 : i32, i32
  }
  func.func @transform_1(%arg0: i32, %arg1: i32) -> (i32, i32) {
    %c0_i32 = arith.constant 0 : i32
    %c0_i32_0 = arith.constant 0 : i32
    %c0_i32_1 = arith.constant 0 : i32
    return %c0_i32, %c0_i32_0 : i32, i32
  }
  func.func @transform_2(%arg0: i32, %arg1: i32) -> (i32, i32) {
    %c0_i32 = arith.constant 0 : i32
    %c0_i32_0 = arith.constant 0 : i32
    %c0_i32_1 = arith.constant 0 : i32
    return %c0_i32, %c0_i32_0 : i32, i32
  }
  func.func @transform_3(%arg0: i32, %arg1: i32) -> (i32, i32) {
    %c0_i32 = arith.constant 0 : i32
    %c0_i32_0 = arith.constant 0 : i32
    return %arg1, %c0_i32 : i32, i32
  }
  func.func @transform_4(%arg0: i32, %arg1: i32) -> (i32, i32) {
    %c0_i32 = arith.constant 0 : i32
    %c0_i32_0 = arith.constant 0 : i32
    return %c0_i32, %arg1 : i32, i32
  }
  func.func @transform_5(%arg0: i32, %arg1: i32) -> (i32, i32) {
    %c0_i32 = arith.constant 0 : i32
    %c0_i32_0 = arith.constant 0 : i32
    return %c0_i32, %arg0 : i32, i32
  }
}

</mosaic_0001>

<bundles_post_ra>
// kernel: tpu_custom_call.1
= control target key start
LH: loop header
LB: loop body
LE: loop exit
PB: predicated region body
PF: predicated region fallthrough
CT: control target
= control target key end

     0   :  { %s3120_s0 = inlined_call_operand.hbm [shape: f32[16,1024], index: 0, kind: input, shape index: {}]   ;;  %s3121_s1 = inlined_call_operand.hbm [shape: f32[64,16], index: 1, kind: input, shape index: {}]   ;;  %s3122_s2 = inlined_call_operand.hbm [shape: s32[64,1], index: 2, kind: input, shape index: {}]   ;;  %s3123_s3 = inlined_call_operand.hbm [shape: s32[1024,1], index: 3, kind: input, shape index: {}]   ;;  %s3124_s4 = inlined_call_operand.hbm [shape: s32[1,1024], index: 4, kind: input, shape index: {}]   ;;  %s3125_s5 = inlined_call_operand.hbm [shape: f32[64,256], index: 5, kind: output, shape index: {}]  }
   0x1   :  { %3153 = sst [smem:[#allocation26_spill]] %s3121_s1 }
   0x2   :  { %3154 = sst [smem:[#allocation27_spill]] %s3123_s3 }
   0x3   :  { %3155 = sst [smem:[#allocation28_spill]] %s3125_s5 }
   0x4   :  { %10 = vsyncpa [#allocation3], 0 }
   0x5   :  { %12 = vsyncpa [#allocation3 + $0x1], 0 }
   0x6   :  { %13 = vsyncpa [#allocation6], 0 }
   0x7   :  { %14 = vsyncpa [#allocation9], 0 }
   0x8   :  { %16 = vsyncpa [#allocation9 + $0x1], 0 }
   0x9   :  { %17 = vsyncpa [#allocation4], 0 }
   0xa   :  { %19 = vsyncpa [#allocation4 + $0x1], 0  ;;  %s2336_s18 = smov 0   ;;  %s2338_s19 = smov 0  }
   0xb   :  { %s2340_s20 = smov 0   ;;  %s2342_s21 = smov 0  }
   0xc   :  { %s2344_s22 = smov 0   ;;  %s2346_s23 = smov 0  }
   0xd   :  { %s2348_s24 = smov 0   ;;  %s2350_s25 = smov 0  }
   0xe   :  { %s2352_s26 = smov 0   ;;  %s2354_s27 = smov 0  }
   0xf   :  { %s2356_s28 = smov 0  }
  0x10 LB: > { %3156 = sst [smem:[#allocation16_spill]] %s2246_s18  ;;  %s2390_s29 = sadd.s32 4294967295, %s2286_s28   ;;  %s2286_s28 = sphi %s2356_s28, %s25_s28   ;;  %s2282_s27 = sphi %s2354_s27, %s3203_s27   ;;  %s2278_s26 = sphi %s2352_s26, %s3210_s26   ;;  %s2274_s25 = sphi %s2350_s25, %s3201_s25   ;;  %s2270_s24 = sphi %s2348_s24, %s3209_s24   ;;  %s2266_s23 = sphi %s2346_s23, %s3200_s23   ;;  %s2262_s22 = sphi %s2344_s22, %s3208_s22   ;;  %s2258_s21 = sphi %s2342_s21, %s3207_s21   ;;  %s2254_s20 = sphi %s2340_s20, %s3206_s20   ;;  %s2250_s19 = sphi %s2338_s19, %s3205_s19   ;;  %s2246_s18 = sphi %s2336_s18, %s3204_s18  }
  0x11   : > { %3157 = sst [smem:[#allocation17_spill]] %s2266_s23  ;;  %s1569_s30 = sadd.s32 4294967294, %s2286_s28  }
  0x12   : > { %3158 = sst [smem:[#allocation18_spill]] %s2274_s25  ;;  %p51_p0 = scmp.ne.s32.totalorder %s2266_s23, %s2262_s22 }
  0x13   : > { %3159 = sst [smem:[#allocation19_spill]] %s2282_s27  ;;  %p52_p1 = scmp.eq.s32.totalorder %s2286_s28, 0 }
  0x14   : > { %3160 = sst [smem:[#allocation20_spill]] %s2286_s28  ;;  %p57_p2 = scmp.ne.s32.totalorder %s2262_s22, %s2258_s21 }
  0x15   : > { %p3128_p3 = scmp.eq.s32.totalorder %s2390_s29, 0  ;;  %p2400_p4 = por %p52_p1, %p51_p0 }
  0x16   : > { %p174_p5 = scmp.ne.s32.totalorder %s2254_s20, %s2250_s19  ;;  %p175_p7 = scmp.eq.s32.totalorder %s2390_s29, 3 }
  0x17   : > { %s3161_s8 = scalar_select %p2400_p4, 1, 0 }
  0x18   : > { %p2408_p6 = por %p3128_p3, %p57_p2  ;;  %p180_p8 = scmp.ne.s32.totalorder %s2250_s19, %s2246_s18 }
  0x19   : > { %p181_p9 = scmp.eq.s32.totalorder %s1569_s30, 3  ;;  %p2415_p10 = por %p175_p7, %p174_p5 }
  0x1a   : > { %s3162_s9 = scalar_select %p2408_p6, 1, 0 }
  0x1b   : > { %s3163_s10 = scalar_select %p2415_p10, 1, 0 }
  0x1c   : > { %p1570_p11 = scmp.ge.s32.totalorder %s2286_s28, 1  ;;  %p2420_p12 = por %p181_p9, %p180_p8 }
  0x1d   : > { %3164 = sst [smem:[#allocation21_spill]] %s3163_s10  ;;  %p188_p13 = scmp.lt.s32.totalorder %s2286_s28, 5 }
  0x1e   : > { %s3165_s11 = scalar_select %p2420_p12, 1, 0 }
  0x1f   : > { %p2425_p0 = pnand %p1570_p11, %p188_p13  ;;  %s2288_s13 = smov [#allocation5]  }
  0x20   : > { %3166 = sst [smem:[#allocation22_spill]] %s3165_s11  ;;  %s200_s14 = sshll.u32 %s2288_s13, 4  ;;  %s201_s14 = int_to_ptr.vmem [resolvable:$true] %s200_s14 }
  0x21   : > { %s3167_s12 = scalar_select %p2425_p0, 1, 0 }
  0x22   : > { %p1879_p1 = pneg %p2425_p0  ;;  %s34_s16 = sadd.s32 1, %s2278_s26 }
  0x23   : > { %s3169_s1 = sld [smem:[#allocation26_spill]] }
  0x24   : > { %p2433_p2 = pnand %p1879_p1, %p3128_p3 }
  0x26   : > { %s3168_s15 = scalar_select %p2433_p2, 1, 0 }
  0x27   : > { %p3143_p7 = pneg %p2433_p2 }
  0x29   : > { %s2010_s30 = scalar_lea.hbm %s3169_s1, 1024 }
  0x2a   : > { %p2011_p5 = scmp.ne.s32.totalorder %s3169_s1, %s2010_s30  ;;  %p2017_p11 = scmp.lt.u32.totalorder %s2010_s30, %s3169_s1 }
  0x2c   : > { %p2013_p8 = pnand %p3143_p7, %p2011_p5 }
  0x2e   : > { %p2014_p9 = pneg %p2013_p8 }
  0x30   : > { %p2019_p13 = pnand %p2017_p11, %p2014_p9 }
  0x32   : > { %2022 = shalt.err (!%p2019_p13)
}
  0x33   : > { %s2023_s18 = scalar_lea.vmem %s201_s14, 1024  ;;  %p2031_p10 = scmp.lt.s32.totalorder %s201_s14, %s201_s14 }
  0x34   : > { %p2024_p1 = scmp.ne.s32.totalorder %s201_s14, %s2023_s18  ;;  %p2032_p6 = scmp.lt.s32.totalorder %s2023_s18, %s2023_s18 }
  0x36   : > { %p2026_p3 = pnand %p2024_p1, %p3143_p7  ;;  %p2033_p0 = por %p2032_p6, %p2031_p10 }
  0x38   : > { %p2027_p12 = pneg %p2026_p3 }
  0x3a   : > { %p2034_p4 = pnand %p2033_p0, %p2027_p12 }
  0x3c   : > { %2037 = shalt.err (!%p2034_p4)
}
  0x3d   : > { %s3132_s6 = smov 128   ;;  %s3134_s7 = smov 8  }
  0x3e   : > { %1882 = dma.hbm_to_vmem [thread:$0]  (!%p2433_p2), %s3169_s1, 1024, %s201_s14, [#allocation6], %s3132_s6, %s3132_s6, %s3134_s7  }
  0x3f   : > { %p35_p3 = scmp.ge.s32.totalorder %s34_s16, 2  ;;  %s37_s17 = sadd.s32 1, %s2282_s27 }
  0x40   : > { %p1902_p4 = scmp.lt.s32.totalorder %s2286_s28, 4  ;;  %s2466_s21 = sand.u32 1, %s2266_s23  }
  0x41   : > { %s3212_s16 = smov (%p35_p3, %s34_s16), 0  ;;  %s3214_s17 = smov (!%p35_p3, %s37_s17), %s2282_s27 }
  0x42   : > { %3170 = sst [smem:[#allocation23_spill]] %s3212_s16  ;;  %s41_s30 = ssub.s32 %s2278_s26, %s3212_s16 }
  0x43   : > { %p3171_p6 = scmp.ne.s32.totalorder %s3161_s8, 0  ;;  %p39_p12 = scmp.ge.s32.totalorder %s3214_s17, 2 }
  0x44   : > { %p42_p0 = scmp.eq.s32.totalorder %s41_s30, 0  ;;  %s248_s14 = sand.u32 1, %s2286_s28  }
  0x45   : > { %p2475_p10 = pnand %p1902_p4, %p3171_p6  ;;  %s3216_s17 = smov (%p39_p12, %s3214_s17), 0 }
  0x46   : > { %3173 = sst [smem:[#allocation24_spill]] %s3216_s17  ;;  %s3174_s18 = sadd.s32 1, %s2266_s23 }
  0x47   : > { %s3172_s13 = scalar_select %p2475_p10, 1, 0 }
  0x48   : > { %s2485_s11 = scalar_select %p42_p0, %s2266_s23, %s3174_s18  }
  0x49   : > { %s161_s6 = ssub.s32 %s2282_s27, %s3216_s17  ;;  %s1577_s7 = sshll.u32 %s2466_s21, 9 }
  0x4a   : > { %3175 = sst [smem:[#allocation25_spill]] %s2485_s11  ;;  %p162_p5 = scmp.eq.s32.totalorder %s161_s6, 0 }
  0x4b   : > { %s1677_s1 = sshll.u32 %s2278_s26, 13  ;;  %s3176_s16 = sadd.s32 1, %s2254_s20 }
  0x4c   : > { %s2494_s8 = scalar_select %p162_p5, %s2254_s20, %s3176_s16  }
  0x4d   : > { %s3177_s3 = sld [smem:[#allocation27_spill]]  ;;  %s252_s30 = scalar_lea.vmem [#allocation8], %s1577_s7 }
  0x4e   : > { %s259_s28 = sshll.u32 %s252_s30, 4  ;;  %s2503_s18 = scalar_lea.sflag [#allocation9], %s248_s14  ;;  %s2501_s28 = int_to_ptr.vmem [resolvable:$true] %s259_s28 }
  0x4f   : > { %p2509_p9 = pneg %p2475_p10 }
  0x51   : > { %s3178_s16 = scalar_select %p2509_p9, 1, 0 }
  0x53   : > { %s2499_s25 = scalar_lea.hbm %s3177_s3, %s1677_s1  ;;  %s2043_s10 = scalar_lea.hbm %s3177_s3, 16384 }
  0x54   : > { %s2038_s6 = scalar_lea.hbm %s2499_s25, 8192  ;;  %p2044_p1 = scmp.lt.u32.totalorder %s2499_s25, %s3177_s3 }
  0x55   : > { %p2039_p8 = scmp.ne.s32.totalorder %s2499_s25, %s2038_s6  ;;  %p2045_p3 = scmp.lt.u32.totalorder %s2043_s10, %s2038_s6 }
  0x56   : > { %p2047_p6 = scmp.lt.u32.totalorder %s2038_s6, %s2499_s25 }
  0x57   : > { %p2041_p11 = pnand %p2509_p9, %p2039_p8  ;;  %p2046_p4 = por %p2045_p3, %p2044_p1 }
  0x59   : > { %p2042_p13 = pneg %p2041_p11  ;;  %p2048_p12 = por %p2047_p6, %p2046_p4 }
  0x5b   : > { %p2049_p0 = pnand %p2048_p12, %p2042_p13 }
  0x5d   : > { %2052 = shalt.err (!%p2049_p0)
}
  0x5e   : > { %s2053_s14 = scalar_lea.vmem %s2501_s28, 8192  ;;  %s2291_s1 = smov [#allocation8]  }
  0x5f   : > { %p2054_p5 = scmp.ne.s32.totalorder %s2501_s28, %s2053_s14  ;;  %s2058_s5 = sshll.u32 %s2291_s1, 4  ;;  %s2059_s5 = int_to_ptr.vmem [resolvable:$false] %s2058_s5 }
  0x60   : > { %s2060_s7 = scalar_lea.vmem %s2059_s5, 16384  ;;  %p2061_p7 = scmp.lt.s32.totalorder %s2501_s28, %s2059_s5 }
  0x61   : > { %p2056_p8 = pnand %p2054_p5, %p2509_p9  ;;  %p2062_p2 = scmp.lt.s32.totalorder %s2060_s7, %s2053_s14 }
  0x63   : > { %p2057_p11 = pneg %p2056_p8  ;;  %p2063_p1 = por %p2062_p2, %p2061_p7 }
  0x65   : > { %p2064_p3 = pnand %p2063_p1, %p2057_p11 }
  0x67   : > { %2067 = shalt.err (!%p2064_p3)
}
  0x68   : > { %s3179_s6 = smov 8   ;;  %s3180_s10 = smov 128  }
  0x69   : > { %1892 = dma.hbm_to_vmem [thread:$0]  (!%p2475_p10), %s2499_s25, 8192, %s2501_s28, %s2503_s18, %s3180_s10, %s3180_s10, %s3179_s6  }
  0x6a   : > { %s2292_s30 = smov [#allocation7]   ;;  %s1574_s3 = sshll.u32 %s2466_s21, 6 }
  0x6b   : > { %s213_s1 = sshll.u32 %s2292_s30, 4  ;;  %s2068_s7 = scalar_lea.hbm %s3122_s2, 1024  ;;  %s214_s1 = int_to_ptr.vmem [resolvable:$true] %s213_s1 }
  0x6c   : > { %p2069_p2 = scmp.ne.s32.totalorder %s3122_s2, %s2068_s7  ;;  %p3181_p7 = scmp.ne.s32.totalorder %s3168_s15, 0 }
  0x6d   : > { %p2075_p12 = scmp.lt.u32.totalorder %s2068_s7, %s3122_s2 }
  0x6e   : > { %p3182_p13 = pneg %p3181_p7 }
  0x70   : > { %p2071_p4 = pnand %p2069_p2, %p3182_p13 }
  0x72   : > { %p2072_p6 = pneg %p2071_p4 }
  0x74   : > { %p2077_p0 = pnand %p2075_p12, %p2072_p6 }
  0x76   : > { %2080 = shalt.err (!%p2077_p0)
}
  0x77   : > { %s2081_s25 = scalar_lea.vmem %s214_s1, 1024  ;;  %p3183_p8 = pmov %p3182_p13 }
  0x78   : > { %p2082_p5 = scmp.ne.s32.totalorder %s214_s1, %s2081_s25  ;;  %p2089_p3 = scmp.lt.s32.totalorder %s214_s1, %s214_s1 }
  0x79   : > { %p2090_p10 = scmp.lt.s32.totalorder %s2081_s25, %s2081_s25 }
  0x7a   : > { %p2084_p11 = pnand %p2082_p5, %p3183_p8 }
  0x7b   : > { %p2091_p9 = por %p2090_p10, %p2089_p3 }
  0x7c   : > { %p2085_p1 = pneg %p2084_p11 }
  0x7e   : > { %p2092_p2 = pnand %p2091_p9, %p2085_p1 }
  0x80   : > { %2095 = shalt.err (!%p2092_p2)
}
  0x81   : > { %1885 = dma.hbm_to_vmem [thread:$0]  (!%p3181_p7), %s3122_s2, 1024, %s214_s1, [#allocation6], %s3180_s10, %s3180_s10, %s3179_s6  }
  0x82   : > { %s1676_s28 = sshll.u32 %s2278_s26, 9  ;;  %s231_s15 = scalar_lea.vmem [#allocation2], %s1574_s3 }
  0x83   : > { %s2564_s30 = scalar_lea.hbm %s3120_s0, %s1676_s28  ;;  %s238_s5 = sshll.u32 %s231_s15, 4  ;;  %s2566_s5 = int_to_ptr.vmem [resolvable:$true] %s238_s5 }
  0x84   : > { %s228_s14 = scalar_lea.sflag [#allocation3], %s2466_s21  ;;  %s2096_s7 = scalar_lea.hbm %s2564_s30, 1024 }
  0x85   : > { %p2097_p10 = scmp.ne.s32.totalorder %s2564_s30, %s2096_s7  ;;  %p3184_p9 = scmp.ne.s32.totalorder %s3178_s16, 0 }
  0x86   : > { %s2101_s1 = scalar_lea.hbm %s3120_s0, 2048  ;;  %p2102_p4 = scmp.lt.u32.totalorder %s2564_s30, %s3120_s0 }
  0x87   : > { %p2099_p13 = pnand %p2097_p10, %p3184_p9  ;;  %p2103_p6 = scmp.lt.u32.totalorder %s2101_s1, %s2096_s7 }
  0x88   : > { %p2105_p0 = scmp.lt.u32.totalorder %s2096_s7, %s2564_s30 }
  0x89   : > { %p2100_p7 = pneg %p2099_p13  ;;  %p2104_p12 = por %p2103_p6, %p2102_p4 }
  0x8b   : > { %p2106_p5 = por %p2105_p0, %p2104_p12 }
  0x8d   : > { %p2107_p8 = pnand %p2106_p5, %p2100_p7 }
  0x8f   : > { %2110 = shalt.err (!%p2107_p8)
}
  0x90   : > { %s2111_s3 = scalar_lea.vmem %s2566_s5, 1024  ;;  %s2293_s27 = smov [#allocation2]  }
  0x91   : > { %p2112_p11 = scmp.ne.s32.totalorder %s2566_s5, %s2111_s3  ;;  %s2116_s28 = sshll.u32 %s2293_s27, 4  ;;  %s2117_s28 = int_to_ptr.vmem [resolvable:$false] %s2116_s28 }
  0x92   : > { %s2118_s17 = scalar_lea.vmem %s2117_s28, 2048  ;;  %p2119_p2 = scmp.lt.s32.totalorder %s2566_s5, %s2117_s28 }
  0x93   : > { %p2114_p1 = pnand %p2112_p11, %p3184_p9  ;;  %p2120_p10 = scmp.lt.s32.totalorder %s2118_s17, %s2111_s3 }
  0x95   : > { %p2115_p3 = pneg %p2114_p1  ;;  %p2121_p13 = por %p2120_p10, %p2119_p2 }
  0x97   : > { %p2122_p4 = pnand %p2121_p13, %p2115_p3 }
  0x99   : > { %2125 = shalt.err (!%p2122_p4)
}
  0x9a   : > { %s2294_s11 = smov 1024   ;;  %s2295_s15 = smov 512  }
  0x9b   : > { %s2296_s7 = smov 32   ;;  %p3185_p7 = scmp.ne.s32.totalorder %s3172_s13, 0 }
  0x9c   : > { %s1580_s6 = sshll.u32 %s2466_s21, 2  ;;  %s1678_s10 = sshll.u32 %s2278_s26, 6 }
  0x9d   : > { %1889 = dma.hbm_to_vmem [thread:$0]  (!%p3185_p7), %s2564_s30, 1024, %s2566_s5, %s228_s14, %s2294_s11, %s2295_s15, %s2296_s7  }
  0x9e   : > { %s2597_s23 = scalar_lea.hbm %s3124_s4, %s1678_s10  ;;  %s273_s3 = scalar_lea.vmem [#allocation10], %s1580_s6 }
  0x9f   : > { %s281_s27 = sshll.u32 %s273_s3, 4  ;;  %s2126_s28 = scalar_lea.hbm %s2597_s23, 64  ;;  %s282_s27 = int_to_ptr.vmem [resolvable:$true] %s281_s27 }
  0xa0   : > { %p2127_p6 = scmp.ne.s32.totalorder %s2597_s23, %s2126_s28  ;;  %s2131_s5 = scalar_lea.hbm %s3124_s4, 128 }
  0xa1   : > { %p2132_p5 = scmp.lt.u32.totalorder %s2597_s23, %s3124_s4  ;;  %p2133_p8 = scmp.lt.u32.totalorder %s2131_s5, %s2126_s28 }
  0xa2   : > { %p2129_p12 = pnand %p2127_p6, %p3184_p9  ;;  %p2135_p1 = scmp.lt.u32.totalorder %s2126_s28, %s2597_s23 }
  0xa3   : > { %p2134_p11 = por %p2133_p8, %p2132_p5 }
  0xa4   : > { %p2130_p0 = pneg %p2129_p12 }
  0xa5   : > { %p2136_p3 = por %p2135_p1, %p2134_p11 }
  0xa7   : > { %p2137_p2 = pnand %p2136_p3, %p2130_p0 }
  0xa9   : > { %2140 = shalt.err (!%p2137_p2)
}
  0xaa   : > { %s2141_s11 = scalar_lea.vmem %s282_s27, 64  ;;  %s2297_s15 = smov [#allocation10]  }
  0xab   : > { %p2142_p10 = scmp.ne.s32.totalorder %s282_s27, %s2141_s11  ;;  %s2146_s7 = sshll.u32 %s2297_s15, 4  ;;  %s2147_s7 = int_to_ptr.vmem [resolvable:$false] %s2146_s7 }
  0xac   : > { %s2148_s6 = scalar_lea.vmem %s2147_s7, 128  ;;  %p2149_p6 = scmp.lt.s32.totalorder %s282_s27, %s2147_s7 }
  0xad   : > { %p2144_p13 = pnand %p2142_p10, %p3184_p9  ;;  %p2150_p12 = scmp.lt.s32.totalorder %s2148_s6, %s2141_s11 }
  0xaf   : > { %p2145_p4 = pneg %p2144_p13  ;;  %p2151_p7 = por %p2150_p12, %p2149_p6 }
  0xb1   : > { %p2152_p5 = pnand %p2151_p7, %p2145_p4 }
  0xb3   : > { %2155 = shalt.err (!%p2152_p5)
}
  0xb4   : > { %p3186_p8 = scmp.ne.s32.totalorder %s3172_s13, 0  ;;  %p3187_p0 = scmp.ne.s32.totalorder %s3167_s12, 0 }
  0xb5   : > { %s292_s16 = sand.u32 (!%p3187_p0), 1, %s2262_s22   ;;  %p3188_p9 = scmp.ne.s32.totalorder (!%p3187_p0), %s3162_s9, 0 }
  0xb6   : > { %1895 = dma.hbm_to_vmem [thread:$0]  (!%p3186_p8), %s2597_s23, 64, %s282_s27, %s2503_s18  }
  0xb7   : > { %290 = sbr.rel (%p3187_p0) target bundleno = 734 (0x2de), region = 40  ;;  %s1584_s10 = sshll.u32 (!%p3187_p0), %s292_s16, 6 }
  0xb8   : > { %s293_s1 = scalar_lea.sflag (!%p3187_p0), [#allocation3], %s292_s16  ;;  %s2620_s25 = scalar_lea.vmem (!%p3187_p0), [#allocation2], %s1584_s10 }
  0xbe   : > { %2229 = dma.done.wait (%p3188_p9), %s293_s1, 1024  }
  0xbf   : > { %2231 = vsyncadd (%p3188_p9), %s293_s1, 4294966272  ;;  %p3189_p7 = scmp.eq.s32.totalorder %s2390_s29, 0 }
  0xc1   : > { %2233 = dma.done.wait (%p3189_p7), [#allocation6], 2048   ;;  %p3190_p11 = pmov %p3189_p7 }
  0xc2   : > { %s309_s12 = sand.u32 1, %s2390_s29   ;;  %s1587_s13 = sshll.u32 %s292_s16, 9 }
  0xc3   : > { %2235 = vsyncadd (%p3190_p11), [#allocation6], 4294965248  ;;  %s310_s18 = scalar_lea.sflag [#allocation9], %s309_s12  ;;  %s2631_s23 = scalar_lea.vmem [#allocation8], %s1587_s13 }
  0xc4   : > { %2237 = dma.done.wait (%p3188_p9), %s310_s18, 8256  }
  0xc5   : > { %2239 = vsyncadd (%p3188_p9), %s310_s18, 4294959040  ;;  %s1588_s3 = sshll.u32 %s292_s16, 2  ;;  %s356_s27 = sand.u32 1, %s2250_s19  }
  0xc6   : > { %s1589_s28 = sshll.u32 %s356_s27, 6  ;;  %s2640_s30 = scalar_lea.vmem [#allocation10], %s1588_s3 }
  0xc7   : > { %s2642_s21 = scalar_lea.vmem [#allocation11], %s1589_s28  ;;  %p1590_p1 = scmp.ne.s32.totalorder %s2270_s24, 0 }
  0xc8   : > { %v2298_v0 = vmov (!%p1590_p1), 0.0  }
  0xc9   : > { %365 = sbr.rel (%p1590_p1) target bundleno = 208 (0xd0), region = 64  ;;  %366 = vst [vmem:[%s2642_s21] sm:$0xff] (!%p1590_p1), %v2298_v0  ;;  %367 = vst [vmem:[%s2642_s21 + $0x8] sm:$0xff] (!%p1590_p1), %v2298_v0 }
  0xca   : > { %368 = vst [vmem:[%s2642_s21 + $0x10] sm:$0xff] (!%p1590_p1), %v2298_v0  ;;  %369 = vst [vmem:[%s2642_s21 + $0x18] sm:$0xff] (!%p1590_p1), %v2298_v0 }
  0xcb   : > { %370 = vst [vmem:[%s2642_s21 + $0x20] sm:$0xff] (!%p1590_p1), %v2298_v0  ;;  %371 = vst [vmem:[%s2642_s21 + $0x28] sm:$0xff] (!%p1590_p1), %v2298_v0 }
  0xcc   : > { %372 = vst [vmem:[%s2642_s21 + $0x30] sm:$0xff] (!%p1590_p1), %v2298_v0  ;;  %373 = vst [vmem:[%s2642_s21 + $0x38] sm:$0xff] (!%p1590_p1), %v2298_v0 }
  0xd0 PF: > { %v446_v1 = vld [vmem:[%s2631_s23 + $0x180] sm:$0xff]  ;;  %v2299_v3 = vmov 0   ;;  %v447_v4 = vld [vmem:[%s2631_s23 + $0x188] sm:$0xff]  ;;  %v2300_v6 = vmov 0.0   ;;  %v377_v9 = vld [vmem:[%s2620_s25 + $0x18] sm:$0xff]  ;;  %vm463_vm0 = vcmask 130048  }
  0xd1   : > { %v414_v2 = vld [vmem:[%s2631_s23 + $0x80] sm:$0xff]  ;;  %2009 = vset.pattern.permute.xlu1 %v2299_v3  ;;  %2008 = vset.pattern.permute.xlu0 %v2299_v3  ;;  %v415_v5 = vld [vmem:[%s2631_s23 + $0x88] sm:$0xff]  ;;  %v381_v10 = vld [vmem:[%s2620_s25 + $0x38] sm:$0xff]  ;;  %s3191_s24 = sld [smem:[#allocation18_spill]]  ;;  %s3192_s9 = sld [smem:[#allocation21_spill]] }
  0xd2   : > { %968 = vperm.xlu1 %2009, %v446_v1   ;;  %872 = vperm.xlu0 %2008, %v414_v2   ;;  %v375_v7 = vld [vmem:[%s2620_s25 + $0x8] sm:$0xff]  ;;  %v1795_v12 = vpack.c.bf16 %v381_v10, %v377_v9  ;;  %v374_v13 = vld [vmem:[%s2620_s25] sm:$0xff]  ;;  %v376_v15 = vld [vmem:[%s2620_s25 + $0x10] sm:$0xff]  ;;  %s1422_s5 = sshll.u32 %s2642_s21, 4  ;;  %s3193_s11 = sld [smem:[#allocation28_spill]]  ;;  %s3054_s5 = int_to_ptr.vmem [resolvable:$true] %s1422_s5 }
  0xd3   : > { %552 = vmatprep.mubr.f32.mxu0 %v2300_v6  ;;  %665 = vmatprep.mubr.f32.mxu1 %v2300_v6  ;;  %v379_v8 = vld [vmem:[%s2620_s25 + $0x28] sm:$0xff]  ;;  %v378_v14 = vld [vmem:[%s2620_s25 + $0x20] sm:$0xff]  ;;  %v380_v19 = vld [vmem:[%s2620_s25 + $0x30] sm:$0xff]  ;;  %s3059_s7 = scalar_lea.sflag [#allocation4], %s356_s27  ;;  %s2156_s6 = scalar_lea.vmem %s3054_s5, 1024 }
  0xd4   : > { %v1791_v11 = vpack.c.bf16 %v379_v8, %v375_v7  ;;  %v399_v16 = vld [vmem:[%s2631_s23 + $0x8] sm:$0xff]  ;;  %v398_v17 = vld [vmem:[%s2631_s23] sm:$0xff]  ;;  %v1793_v18 = vpack.c.bf16 %v378_v14, %v374_v13  ;;  %1796 = vmatprep.subr.bf16.mxu1 %v1795_v12  ;;  %v1797_v20 = vpack.c.bf16 %v380_v19, %v376_v15  ;;  %v417_v25 = vld [vmem:[%s2631_s23 + $0x98] sm:$0xff]  ;;  %p2157_p3 = scmp.ne.s32.totalorder %s3054_s5, %s2156_s6  ;;  %s2302_s16 = smov [#allocation11]  }
  0xd5   : > { %v382_v21 = vld [vmem:[#allocation5] sm:$0xff]  ;;  %v431_v22 = vld [vmem:[%s2631_s23 + $0x108] sm:$0xff]  ;;  %v416_v26 = vld [vmem:[%s2631_s23 + $0x90] sm:$0xff]  ;;  %s2160_s10 = sshll.u32 %s2302_s16, 4  ;;  %s2161_s10 = int_to_ptr.vmem [resolvable:$false] %s2160_s10 }
  0xd6   : > { %971 = vperm.xlu1 %2009, %v447_v4   ;;  %875 = vperm.xlu0 %2008, %v415_v5   ;;  %v430_v23 = vld [vmem:[%s2631_s23 + $0x100] sm:$0xff]  ;;  %v383_v24 = vld [vmem:[#allocation5 + $0x8] sm:$0xff]  ;;  %v384_v27 = vld [vmem:[#allocation5 + $0x10] sm:$0xff]  ;;  %s2162_s1 = scalar_lea.vmem %s2161_s10, 2048  ;;  %p2163_p4 = scmp.lt.s32.totalorder %s3054_s5, %s2161_s10 }
  0xd7   : > { %1792 = vmatprep.subr.bf16.mxu0 %v1791_v11  ;;  %1798 = vmatpush1.bf16.msra.mxu1 %v1797_v20  ;;  %v449_v28 = vld [vmem:[%s2631_s23 + $0x198] sm:$0xff]  ;;  %v448_v29 = vld [vmem:[%s2631_s23 + $0x190] sm:$0xff]  ;;  %v386_v33 = vld [vmem:[#allocation5 + $0x20] sm:$0xff]  ;;  %s1607_s29 = sshll.u32 %s3191_s24, 7  ;;  %p3194_p2 = scmp.ne.s32.totalorder %s3192_s9, 0 }
  0xd8   : > { %1794 = vmatpush1.bf16.msra.mxu0 %v1793_v18  ;;  %v385_v30 = vld [vmem:[#allocation5 + $0x18] sm:$0xff]  ;;  %v400_v32 = vld [vmem:[%s2631_s23 + $0x10] sm:$0xff]  ;;  %v387_v36 = vld [vmem:[#allocation5 + $0x28] sm:$0xff]  ;;  %s3052_s15 = scalar_lea.hbm %s3193_s11, %s1607_s29  ;;  %p2164_p6 = scmp.lt.s32.totalorder %s2162_s1, %s2156_s6 }
  0xd9   : > { %v401_v31 = vld [vmem:[%s2631_s23 + $0x18] sm:$0xff]  ;;  %v432_v35 = vld [vmem:[%s2631_s23 + $0x110] sm:$0xff]  ;;  %v419_v37 = vld [vmem:[%s2631_s23 + $0xa8] sm:$0xff]  ;;  %p2158_p10 = pnand %p2157_p3, %p3194_p2 }
  0xda   : > { %827 = vperm.xlu1 %2009, %v399_v16   ;;  %824 = vperm.xlu0 %2008, %v398_v17   ;;  %v433_v34 = vld [vmem:[%s2631_s23 + $0x118] sm:$0xff]  ;;  %v418_v38 = vld [vmem:[%s2631_s23 + $0xa0] sm:$0xff]  ;;  %v388_v39 = vld [vmem:[#allocation5 + $0x30] sm:$0xff]  ;;  %p2165_p12 = por %p2164_p6, %p2163_p4 }
  0xdb   : > { %1591 = vmatmul.mubr.msk.f32.vlgmr.msra.gmra.mrb[0].mxu0 %vm463_vm0, %v382_v21  ;;  %1599 = vmatmul.mubr.msk.f32.vlgmr.msra.gmra.mrb[0].mxu1 %vm463_vm0, %v382_v21  ;;  %v451_v40 = vld [vmem:[%s2631_s23 + $0x1a8] sm:$0xff]  ;;  %v450_v41 = vld [vmem:[%s2631_s23 + $0x1a0] sm:$0xff]  ;;  %v389_v42 = vld [vmem:[#allocation5 + $0x38] sm:$0xff]  ;;  %p2159_p13 = pneg %p2158_p10 }
  0xdc   : > { %558 = vmatprep.mubr.f32.mxu0 %v2300_v6  ;;  %671 = vmatprep.mubr.f32.mxu1 %v2300_v6  ;;  %v403_v43 = vld [vmem:[%s2631_s23 + $0x28] sm:$0xff]  ;;  %v402_v44 = vld [vmem:[%s2631_s23 + $0x20] sm:$0xff]  ;;  %v421_v47 = vld [vmem:[%s2631_s23 + $0xb8] sm:$0xff] }
  0xdd   : > { %v435_v45 = vld [vmem:[%s2631_s23 + $0x128] sm:$0xff]  ;;  %v434_v46 = vld [vmem:[%s2631_s23 + $0x120] sm:$0xff]  ;;  %v420_v48 = vld [vmem:[%s2631_s23 + $0xb0] sm:$0xff]  ;;  %p2166_p5 = pnand %p2165_p12, %p2159_p13 }
  0xde   : > { %923 = vperm.xlu1 %2009, %v431_v22   ;;  %920 = vperm.xlu0 %2008, %v430_v23   ;;  %v453_v49 = vld [vmem:[%s2631_s23 + $0x1b8] sm:$0xff]  ;;  %v452_v50 = vld [vmem:[%s2631_s23 + $0x1b0] sm:$0xff]  ;;  %v423_v55 = vld [vmem:[%s2631_s23 + $0xc8] sm:$0xff]  ;;  %v738_v22 = vlaneseq }
  0xdf   : > { %1592 = vmatmul.mubr.msk.f32.gmra.mrb[2].mxu0 %vm463_vm0, %v383_v24  ;;  %1600 = vmatmul.mubr.msk.f32.gmra.mrb[2].mxu1 %vm463_vm0, %v383_v24  ;;  %v405_v51 = vld [vmem:[%s2631_s23 + $0x38] sm:$0xff]  ;;  %v404_v52 = vld [vmem:[%s2631_s23 + $0x30] sm:$0xff]  ;;  %v422_v56 = vld [vmem:[%s2631_s23 + $0xc0] sm:$0xff] }
  0xe0   : > { %564 = vmatprep.mubr.f32.mxu0 %v2300_v6  ;;  %677 = vmatprep.mubr.f32.mxu1 %v2300_v6  ;;  %v437_v53 = vld [vmem:[%s2631_s23 + $0x138] sm:$0xff]  ;;  %v436_v54 = vld [vmem:[%s2631_s23 + $0x130] sm:$0xff]  ;;  %v455_v57 = vld [vmem:[%s2631_s23 + $0x1c8] sm:$0xff] }
  0xe1   : > { %v454_v58 = vld [vmem:[%s2631_s23 + $0x1c0] sm:$0xff]  ;;  %v407_v59 = vld [vmem:[%s2631_s23 + $0x48] sm:$0xff]  ;;  %v425_v63 = vld [vmem:[%s2631_s23 + $0xd8] sm:$0xff] }
  0xe2   : > { %881 = vperm.xlu1 %2009, %v417_v25   ;;  %878 = vperm.xlu0 %2008, %v416_v26   ;;  %v406_v60 = vld [vmem:[%s2631_s23 + $0x40] sm:$0xff]  ;;  %v439_v61 = vld [vmem:[%s2631_s23 + $0x148] sm:$0xff]  ;;  %v424_v0 = vld [vmem:[%s2631_s23 + $0xd0] sm:$0xff]  ;;  %v820_v25 = vand.u32 127, %v738_v22  ;;  %v821_v26 = vstv %s1607_s29 }
  0xe3   : > { %1593 = vmatmul.mubr.msk.f32.gmra.mrb[4].mxu0 %vm463_vm0, %v384_v27  ;;  %1601 = vmatmul.mubr.msk.f32.gmra.mrb[4].mxu1 %vm463_vm0, %v384_v27  ;;  %v438_v62 = vld [vmem:[%s2631_s23 + $0x140] sm:$0xff]  ;;  %v457_v1 = vld [vmem:[%s2631_s23 + $0x1d8] sm:$0xff]  ;;  %v456_v2 = vld [vmem:[%s2631_s23 + $0x1d0] sm:$0xff] }
  0xe4   : > { %570 = vmatprep.mubr.f32.mxu0 %v2300_v6  ;;  %683 = vmatprep.mubr.f32.mxu1 %v2300_v6  ;;  %v409_v3 = vld [vmem:[%s2631_s23 + $0x58] sm:$0xff]  ;;  %v408_v4 = vld [vmem:[%s2631_s23 + $0x50] sm:$0xff]  ;;  %v427_v8 = vld [vmem:[%s2631_s23 + $0xe8] sm:$0xff] }
  0xe5   : > { %v441_v5 = vld [vmem:[%s2631_s23 + $0x158] sm:$0xff]  ;;  %v440_v7 = vld [vmem:[%s2631_s23 + $0x150] sm:$0xff]  ;;  %v426_v9 = vld [vmem:[%s2631_s23 + $0xe0] sm:$0xff] }
  0xe6   : > { %977 = vperm.xlu1 %2009, %v449_v28   ;;  %974 = vperm.xlu0 %2008, %v448_v29   ;;  %v459_v10 = vld [vmem:[%s2631_s23 + $0x1e8] sm:$0xff]  ;;  %v458_v11 = vld [vmem:[%s2631_s23 + $0x1e0] sm:$0xff]  ;;  %v429_v16 = vld [vmem:[%s2631_s23 + $0xf8] sm:$0xff] }
  0xe7   : > { %1594 = vmatmul.mubr.msk.f32.gmra.mrb[6].mxu0 %vm463_vm0, %v385_v30  ;;  %1602 = vmatmul.mubr.msk.f32.gmra.mrb[6].mxu1 %vm463_vm0, %v385_v30  ;;  %v411_v12 = vld [vmem:[%s2631_s23 + $0x68] sm:$0xff]  ;;  %v410_v13 = vld [vmem:[%s2631_s23 + $0x60] sm:$0xff]  ;;  %v428_v17 = vld [vmem:[%s2631_s23 + $0xf0] sm:$0xff] }
  0xe8   : > { %576 = vmatprep.mubr.f32.mxu0 %v2300_v6  ;;  %689 = vmatprep.mubr.f32.mxu1 %v2300_v6  ;;  %v443_v14 = vld [vmem:[%s2631_s23 + $0x168] sm:$0xff]  ;;  %v442_v15 = vld [vmem:[%s2631_s23 + $0x160] sm:$0xff]  ;;  %v461_v18 = vld [vmem:[%s2631_s23 + $0x1f8] sm:$0xff] }
  0xe9   : > { %v460_v19 = vld [vmem:[%s2631_s23 + $0x1f0] sm:$0xff]  ;;  %v390_v21 = vld [vmem:[#allocation7] sm:$0xff]  ;;  %v413_v24 = vld [vmem:[%s2631_s23 + $0x78] sm:$0xff] }
  0xea   : > { %833 = vperm.xlu1 %2009, %v401_v31   ;;  %830 = vperm.xlu0 %2008, %v400_v32   ;;  %v412_v20 = vld [vmem:[%s2631_s23 + $0x70] sm:$0xff]  ;;  %v391_v27 = vld [vmem:[#allocation7 + $0x8] sm:$0xff]  ;;  %v445_v28 = vld [vmem:[%s2631_s23 + $0x178] sm:$0xff]  ;;  %v2761_v31 = vadd.s32 %v821_v26, %v820_v25 }
  0xeb   : > { %1595 = vmatmul.mubr.msk.f32.gmra.mrb[8].mxu0 %vm463_vm0, %v386_v33  ;;  %1603 = vmatmul.mubr.msk.f32.gmra.mrb[8].mxu1 %vm463_vm0, %v386_v33  ;;  %v444_v23 = vld [vmem:[%s2631_s23 + $0x170] sm:$0xff]  ;;  %v393_v32 = vld [vmem:[#allocation7 + $0x18] sm:$0xff] }
  0xec   : > { %582 = vmatprep.mubr.f32.mxu0 %v2300_v6  ;;  %695 = vmatprep.mubr.f32.mxu1 %v2300_v6  ;;  %v392_v33 = vld [vmem:[#allocation7 + $0x10] sm:$0xff] }
  0xee   : > { %929 = vperm.xlu1 %2009, %v433_v34   ;;  %926 = vperm.xlu0 %2008, %v432_v35  }
  0xef   : > { %1596 = vmatmul.mubr.msk.f32.gmra.mrb[10].mxu0 %vm463_vm0, %v387_v36  ;;  %1604 = vmatmul.mubr.msk.f32.gmra.mrb[10].mxu1 %vm463_vm0, %v387_v36  ;;  %v395_v36 = vld [vmem:[#allocation7 + $0x28] sm:$0xff] }
  0xf0   : > { %588 = vmatprep.mubr.f32.mxu0 %v2300_v6  ;;  %701 = vmatprep.mubr.f32.mxu1 %v2300_v6 }
  0xf2   : > { %887 = vperm.xlu1 %2009, %v419_v37   ;;  %884 = vperm.xlu0 %2008, %v418_v38   ;;  %v394_v37 = vld [vmem:[#allocation7 + $0x20] sm:$0xff]  ;;  %v2301_v38 = vmov 1.0|1.0  }
  0xf3   : > { %1597 = vmatmul.mubr.msk.f32.gmra.mrb[12].mxu0 %vm463_vm0, %v388_v39  ;;  %1605 = vmatmul.mubr.msk.f32.gmra.mrb[12].mxu1 %vm463_vm0, %v388_v39 }
  0xf4   : > { %594 = vmatprep.mubr.f32.mxu0 %v2300_v6  ;;  %707 = vmatprep.mubr.f32.mxu1 %v2300_v6 }
  0xf6   : > { %983 = vperm.xlu1 %2009, %v451_v40   ;;  %980 = vperm.xlu0 %2008, %v450_v41   ;;  %v397_v41 = vld [vmem:[#allocation7 + $0x38] sm:$0xff] }
  0xf7   : > { %1598 = vmatmul.mubr.msk.f32.gmra.mrb[14].mxu0 %vm463_vm0, %v389_v42  ;;  %1606 = vmatmul.mubr.msk.f32.gmra.mrb[14].mxu1 %vm463_vm0, %v389_v42  ;;  %v396_v42 = vld [vmem:[#allocation7 + $0x30] sm:$0xff] }
  0xfa   : > { %839 = vperm.xlu1 %2009, %v403_v43   ;;  %836 = vperm.xlu0 %2008, %v402_v44  }
  0xfe   : > { %935 = vperm.xlu1 %2009, %v435_v45   ;;  %932 = vperm.xlu0 %2008, %v434_v46  }
 0x102   : > { %893 = vperm.xlu1 %2009, %v421_v47   ;;  %890 = vperm.xlu0 %2008, %v420_v48  }
 0x106   : > { %989 = vperm.xlu1 %2009, %v453_v49   ;;  %986 = vperm.xlu0 %2008, %v452_v50  }
 0x10a   : > { %845 = vperm.xlu1 %2009, %v405_v51   ;;  %842 = vperm.xlu0 %2008, %v404_v52  }
 0x10e   : > { %941 = vperm.xlu1 %2009, %v437_v53   ;;  %938 = vperm.xlu0 %2008, %v436_v54  }
 0x112   : > { %899 = vperm.xlu1 %2009, %v423_v55   ;;  %896 = vperm.xlu0 %2008, %v422_v56  }
 0x116   : > { %995 = vperm.xlu1 %2009, %v455_v57   ;;  %992 = vperm.xlu0 %2008, %v454_v58  }
 0x11a   : > { %851 = vperm.xlu1 %2009, %v407_v59   ;;  %848 = vperm.xlu0 %2008, %v406_v60  }
 0x11e   : > { %947 = vperm.xlu1 %2009, %v439_v61   ;;  %944 = vperm.xlu0 %2008, %v438_v62  }
 0x122   : > { %905 = vperm.xlu1 %2009, %v425_v63   ;;  %902 = vperm.xlu0 %2008, %v424_v0  }
 0x126   : > { %1001 = vperm.xlu1 %2009, %v457_v1   ;;  %998 = vperm.xlu0 %2008, %v456_v2  }
 0x12a   : > { %857 = vperm.xlu1 %2009, %v409_v3   ;;  %854 = vperm.xlu0 %2008, %v408_v4  }
 0x12e   : > { %953 = vperm.xlu1 %2009, %v441_v5   ;;  %950 = vperm.xlu0 %2008, %v440_v7  }
 0x132   : > { %911 = vperm.xlu1 %2009, %v427_v8   ;;  %908 = vperm.xlu0 %2008, %v426_v9  }
 0x136   : > { %1007 = vperm.xlu1 %2009, %v459_v10   ;;  %1004 = vperm.xlu0 %2008, %v458_v11  }
 0x13a   : > { %863 = vperm.xlu1 %2009, %v411_v12   ;;  %860 = vperm.xlu0 %2008, %v410_v13  }
 0x13e   : > { %959 = vperm.xlu1 %2009, %v443_v14   ;;  %956 = vperm.xlu0 %2008, %v442_v15  }
 0x142   : > { %917 = vperm.xlu1 %2009, %v429_v16   ;;  %914 = vperm.xlu0 %2008, %v428_v17  }
 0x146   : > { %1013 = vperm.xlu1 %2009, %v461_v18   ;;  %1010 = vperm.xlu0 %2008, %v460_v19  }
 0x14a   : > { %866 = vperm.xlu1 %2009, %v412_v20   ;;  %715 = vperm.xlu0 %2008, %v390_v21  }
 0x14e   : > { %962 = vperm.xlu1 %2009, %v444_v23   ;;  %869 = vperm.xlu0 %2008, %v413_v24  }
 0x151   : > { %v969_v29 = vpop.permute.xlu1 %968  ;;  %v873_v30 = vpop.permute.xlu0 %872 }
 0x152   : > { %718 = vperm.xlu1 %2009, %v391_v27   ;;  %965 = vperm.xlu0 %2008, %v445_v28   ;;  %vm1063_vm1 = vcmp.eq.s32.totalorder %v2761_v31, %v969_v29  ;;  %vm1031_vm4 = vcmp.eq.s32.totalorder %v2761_v31, %v873_v30 }
 0x155   : > { %v972_v34 = vpop.permute.xlu1 %971  ;;  %v876_v35 = vpop.permute.xlu0 %875 }
 0x156   : > { %vm1064_vm2 = vcmp.eq.s32.totalorder %v2761_v31, %v972_v34  ;;  %vm1032_vm3 = vcmp.eq.s32.totalorder %v2761_v31, %v876_v35  ;;  %724 = vperm.xlu1 %2009, %v393_v32   ;;  %721 = vperm.xlu0 %2008, %v392_v33  }
 0x157   : > { %vm1831_vm5 = vmpackc.low %vm1064_vm2, %vm1063_vm1 }
 0x158   : > { %vm1799_vm6 = vmpackc.low %vm1032_vm3, %vm1031_vm4  ;;  %1832 = vmatprep.subr.msk.bf16.mxu1 %vm1831_vm5, %v2301_v38 }
 0x159   : > { %1800 = vmatprep.subr.msk.bf16.mxu0 %vm1799_vm6, %v2301_v38  ;;  %v828_v39 = vpop.permute.xlu1 %827  ;;  %v825_v40 = vpop.permute.xlu0 %824 }
 0x15a   : > { %vm1016_vm7 = vcmp.eq.s32.totalorder %v2761_v31, %v828_v39  ;;  %vm1015_vm8 = vcmp.eq.s32.totalorder %v2761_v31, %v825_v40  ;;  %730 = vperm.xlu1 %2009, %v395_v36   ;;  %727 = vperm.xlu0 %2008, %v394_v37  }
 0x15b   : > { %vm1801_vm9 = vmpackc.low %vm1016_vm7, %vm1015_vm8 }
 0x15c   : > { %1802 = vmatpush3.bf16.msk.msra.mxu0 %vm1801_vm9, %v2301_v38 }
 0x15d   : > { %v924_v43 = vpop.permute.xlu1 %923  ;;  %v921_v44 = vpop.permute.xlu0 %920 }
 0x15e   : > { %vm1048_vm10 = vcmp.eq.s32.totalorder %v2761_v31, %v924_v43  ;;  %vm1047_vm11 = vcmp.eq.s32.totalorder %v2761_v31, %v921_v44  ;;  %736 = vperm.xlu1 %2009, %v397_v41   ;;  %733 = vperm.xlu0 %2008, %v396_v42  }
 0x15f   : > { %vm1833_vm12 = vmpackc.low %vm1048_vm10, %vm1047_vm11 }
 0x160   : > { %1834 = vmatpush3.bf16.msk.msra.mxu1 %vm1833_vm12, %v2301_v38 }
 0x161   : > { %v882_v45 = vpop.permute.xlu1 %881  ;;  %v879_v46 = vpop.permute.xlu0 %878 }
 0x162   : > { %vm1034_vm13 = vcmp.eq.s32.totalorder %v2761_v31, %v882_v45  ;;  %vm1033_vm14 = vcmp.eq.s32.totalorder %v2761_v31, %v879_v46 }
 0x163   : > { %vm1803_vm15 = vmpackc.low %vm1034_vm13, %vm1033_vm14 }
 0x164   : > { %1804 = vmatprep.subr.msk.bf16.mxu0 %vm1803_vm15, %v2301_v38 }
 0x165   : > { %v978_v47 = vpop.permute.xlu1 %977  ;;  %v975_v48 = vpop.permute.xlu0 %974 }
 0x166   : > { %vm1066_vm0 = vcmp.eq.s32.totalorder %v2761_v31, %v978_v47  ;;  %vm1065_vm1 = vcmp.eq.s32.totalorder %v2761_v31, %v975_v48  ;;  %v739_v47 = vshrl.u32 %v738_v22, 7  ;;  %v462_v22 = vld [vmem:[%s2640_s30] sm:$0xf] }
 0x167   : > { %vm1835_vm2 = vmpackc.low %vm1066_vm0, %vm1065_vm1 }
 0x168   : > { %1836 = vmatprep.subr.msk.bf16.mxu1 %vm1835_vm2, %v2301_v38 }
 0x169   : > { %v834_v49 = vpop.permute.xlu1 %833  ;;  %v831_v50 = vpop.permute.xlu0 %830 }
 0x16a   : > { %vm1018_vm3 = vcmp.eq.s32.totalorder %v2761_v31, %v834_v49  ;;  %vm1017_vm4 = vcmp.eq.s32.totalorder %v2761_v31, %v831_v50 }
 0x16b   : > { %vm1805_vm5 = vmpackc.low %vm1018_vm3, %vm1017_vm4 }
 0x16c   : > { %1806 = vmatpush3.bf16.msk.msra.mxu0 %vm1805_vm5, %v2301_v38 }
 0x16d   : > { %v930_v51 = vpop.permute.xlu1 %929  ;;  %v927_v52 = vpop.permute.xlu0 %926 }
 0x16e   : > { %vm1050_vm6 = vcmp.eq.s32.totalorder %v2761_v31, %v930_v51  ;;  %vm1049_vm7 = vcmp.eq.s32.totalorder %v2761_v31, %v927_v52 }
 0x16f   : > { %vm1837_vm8 = vmpackc.low %vm1050_vm6, %vm1049_vm7 }
 0x170   : > { %1838 = vmatpush3.bf16.msk.msra.mxu1 %vm1837_vm8, %v2301_v38 }
 0x171   : > { %v888_v53 = vpop.permute.xlu1 %887  ;;  %v885_v54 = vpop.permute.xlu0 %884 }
 0x172   : > { %vm1036_vm9 = vcmp.eq.s32.totalorder %v2761_v31, %v888_v53  ;;  %vm1035_vm10 = vcmp.eq.s32.totalorder %v2761_v31, %v885_v54  ;;  %v744_v54 = vsub.s32 1, %v739_v47 }
 0x173   : > { %vm1807_vm11 = vmpackc.low %vm1036_vm9, %vm1035_vm10 }
 0x174   : > { %1808 = vmatprep.subr.msk.bf16.mxu0 %vm1807_vm11, %v2301_v38 }
 0x175   : > { %v984_v55 = vpop.permute.xlu1 %983  ;;  %v981_v56 = vpop.permute.xlu0 %980 }
 0x176   : > { %vm1068_vm12 = vcmp.eq.s32.totalorder %v2761_v31, %v984_v55  ;;  %vm1067_vm13 = vcmp.eq.s32.totalorder %v2761_v31, %v981_v56  ;;  %v740_v56 = vsub.s32 0, %v739_v47 }
 0x177   : > { %vm1839_vm14 = vmpackc.low %vm1068_vm12, %vm1067_vm13 }
 0x178   : > { %1840 = vmatprep.subr.msk.bf16.mxu1 %vm1839_vm14, %v2301_v38 }
 0x179   : > { %v840_v57 = vpop.permute.xlu1 %839  ;;  %v837_v58 = vpop.permute.xlu0 %836 }
 0x17a   : > { %vm1020_vm15 = vcmp.eq.s32.totalorder %v2761_v31, %v840_v57  ;;  %vm1019_vm0 = vcmp.eq.s32.totalorder %v2761_v31, %v837_v58  ;;  %v752_v57 = vsub.s32 3, %v739_v47 }
 0x17b   : > { %vm1809_vm1 = vmpackc.low %vm1020_vm15, %vm1019_vm0 }
 0x17c   : > { %1810 = vmatpush3.bf16.msk.msra.mxu0 %vm1809_vm1, %v2301_v38 }
 0x17d   : > { %v936_v59 = vpop.permute.xlu1 %935  ;;  %v933_v60 = vpop.permute.xlu0 %932 }
 0x17e   : > { %vm1052_vm2 = vcmp.eq.s32.totalorder %v2761_v31, %v936_v59  ;;  %vm1051_vm3 = vcmp.eq.s32.totalorder %v2761_v31, %v933_v60 }
 0x17f   : > { %vm1841_vm4 = vmpackc.low %vm1052_vm2, %vm1051_vm3 }
 0x180   : > { %1842 = vmatpush3.bf16.msk.msra.mxu1 %vm1841_vm4, %v2301_v38 }
 0x181   : > { %v894_v61 = vpop.permute.xlu1 %893  ;;  %v891_v62 = vpop.permute.xlu0 %890 }
 0x182   : > { %vm1038_vm5 = vcmp.eq.s32.totalorder %v2761_v31, %v894_v61  ;;  %vm1037_vm6 = vcmp.eq.s32.totalorder %v2761_v31, %v891_v62 }
 0x183   : > { %vm1811_vm7 = vmpackc.low %vm1038_vm5, %vm1037_vm6 }
 0x184   : > { %1812 = vmatprep.subr.msk.bf16.mxu0 %vm1811_vm7, %v2301_v38 }
 0x185   : > { %v990_v63 = vpop.permute.xlu1 %989  ;;  %v987_v0 = vpop.permute.xlu0 %986 }
 0x186   : > { %vm1070_vm8 = vcmp.eq.s32.totalorder %v2761_v31, %v990_v63  ;;  %vm1069_vm9 = vcmp.eq.s32.totalorder %v2761_v31, %v987_v0  ;;  %v748_v63 = vsub.s32 2, %v739_v47  ;;  %v2898_v0 = vrot.slane %v462_v22, %v744_v54 }
 0x187   : > { %vm1843_vm10 = vmpackc.low %vm1070_vm8, %vm1069_vm9 }
 0x188   : > { %1844 = vmatprep.subr.msk.bf16.mxu1 %vm1843_vm10, %v2301_v38 }
 0x189   : > { %v846_v1 = vpop.permute.xlu1 %845  ;;  %v843_v2 = vpop.permute.xlu0 %842 }
 0x18a   : > { %vm1022_vm11 = vcmp.eq.s32.totalorder %v2761_v31, %v846_v1  ;;  %vm1021_vm12 = vcmp.eq.s32.totalorder %v2761_v31, %v843_v2  ;;  %v2902_v2 = vrot.slane %v462_v22, %v740_v56 }
 0x18b   : > { %vm1813_vm13 = vmpackc.low %vm1022_vm11, %vm1021_vm12 }
 0x18c   : > { %1814 = vmatpush3.bf16.msk.msra.mxu0 %vm1813_vm13, %v2301_v38 }
 0x18d   : > { %v942_v3 = vpop.permute.xlu1 %941  ;;  %v939_v4 = vpop.permute.xlu0 %938 }
 0x18e   : > { %vm1054_vm14 = vcmp.eq.s32.totalorder %v2761_v31, %v942_v3  ;;  %vm1053_vm15 = vcmp.eq.s32.totalorder %v2761_v31, %v939_v4  ;;  %v2904_v3 = vrot.slane %v462_v22, %v752_v57 }
 0x18f   : > { %vm1845_vm0 = vmpackc.low %vm1054_vm14, %vm1053_vm15 }
 0x190   : > { %1846 = vmatpush3.bf16.msk.msra.mxu1 %vm1845_vm0, %v2301_v38 }
 0x191   : > { %v900_v5 = vpop.permute.xlu1 %899  ;;  %v897_v7 = vpop.permute.xlu0 %896 }
 0x192   : > { %vm1040_vm1 = vcmp.eq.s32.totalorder %v2761_v31, %v900_v5  ;;  %vm1039_vm2 = vcmp.eq.s32.totalorder %v2761_v31, %v897_v7 }
 0x193   : > { %vm1815_vm3 = vmpackc.low %vm1040_vm1, %vm1039_vm2 }
 0x194   : > { %1816 = vmatprep.subr.msk.bf16.mxu0 %vm1815_vm3, %v2301_v38 }
 0x195   : > { %v996_v8 = vpop.permute.xlu1 %995  ;;  %v993_v9 = vpop.permute.xlu0 %992 }
 0x196   : > { %vm1072_vm4 = vcmp.eq.s32.totalorder %v2761_v31, %v996_v8  ;;  %vm1071_vm5 = vcmp.eq.s32.totalorder %v2761_v31, %v993_v9 }
 0x197   : > { %vm1847_vm6 = vmpackc.low %vm1072_vm4, %vm1071_vm5 }
 0x198   : > { %1848 = vmatprep.subr.msk.bf16.mxu1 %vm1847_vm6, %v2301_v38 }
 0x199   : > { %v852_v10 = vpop.permute.xlu1 %851  ;;  %v849_v11 = vpop.permute.xlu0 %848 }
 0x19a   : > { %vm1024_vm7 = vcmp.eq.s32.totalorder %v2761_v31, %v852_v10  ;;  %vm1023_vm8 = vcmp.eq.s32.totalorder %v2761_v31, %v849_v11  ;;  %v2913_v10 = vrot.slane %v462_v22, %v748_v63 }
 0x19b   : > { %vm1817_vm9 = vmpackc.low %vm1024_vm7, %vm1023_vm8 }
 0x19c   : > { %1818 = vmatpush3.bf16.msk.msra.mxu0 %vm1817_vm9, %v2301_v38 }
 0x19d   : > { %v948_v12 = vpop.permute.xlu1 %947  ;;  %v945_v13 = vpop.permute.xlu0 %944 }
 0x19e   : > { %vm1056_vm10 = vcmp.eq.s32.totalorder %v2761_v31, %v948_v12  ;;  %vm1055_vm11 = vcmp.eq.s32.totalorder %v2761_v31, %v945_v13 }
 0x19f   : > { %vm1849_vm12 = vmpackc.low %vm1056_vm10, %vm1055_vm11 }
 0x1a0   : > { %1850 = vmatpush3.bf16.msk.msra.mxu1 %vm1849_vm12, %v2301_v38 }
 0x1a1   : > { %v906_v14 = vpop.permute.xlu1 %905  ;;  %v903_v15 = vpop.permute.xlu0 %902 }
 0x1a2   : > { %vm1042_vm13 = vcmp.eq.s32.totalorder %v2761_v31, %v906_v14  ;;  %vm1041_vm14 = vcmp.eq.s32.totalorder %v2761_v31, %v903_v15 }
 0x1a3   : > { %vm1819_vm15 = vmpackc.low %vm1042_vm13, %vm1041_vm14 }
 0x1a4   : > { %1820 = vmatprep.subr.msk.bf16.mxu0 %vm1819_vm15, %v2301_v38 }
 0x1a5   : > { %v1002_v16 = vpop.permute.xlu1 %1001  ;;  %v999_v17 = vpop.permute.xlu0 %998 }
 0x1a6   : > { %vm1074_vm0 = vcmp.eq.s32.totalorder %v2761_v31, %v1002_v16  ;;  %vm1073_vm1 = vcmp.eq.s32.totalorder %v2761_v31, %v999_v17 }
 0x1a7   : > { %vm1851_vm2 = vmpackc.low %vm1074_vm0, %vm1073_vm1 }
 0x1a8   : > { %1852 = vmatprep.subr.msk.bf16.mxu1 %vm1851_vm2, %v2301_v38 }
 0x1a9   : > { %v858_v18 = vpop.permute.xlu1 %857  ;;  %v855_v19 = vpop.permute.xlu0 %854 }
 0x1aa   : > { %vm1026_vm3 = vcmp.eq.s32.totalorder %v2761_v31, %v858_v18  ;;  %vm1025_vm4 = vcmp.eq.s32.totalorder %v2761_v31, %v855_v19 }
 0x1ab   : > { %vm1821_vm5 = vmpackc.low %vm1026_vm3, %vm1025_vm4 }
 0x1ac   : > { %1822 = vmatpush3.bf16.msk.msra.mxu0 %vm1821_vm5, %v2301_v38 }
 0x1ad   : > { %v954_v20 = vpop.permute.xlu1 %953  ;;  %v951_v21 = vpop.permute.xlu0 %950 }
 0x1ae   : > { %vm1058_vm6 = vcmp.eq.s32.totalorder %v2761_v31, %v954_v20  ;;  %vm1057_vm7 = vcmp.eq.s32.totalorder %v2761_v31, %v951_v21  ;;  %v2834_v23 = vpop.f32.mrb[0].mxu0  ;;  %v2841_v27 = vpop.f32.mrb[0].mxu1 }
 0x1af   : > { %vm1853_vm8 = vmpackc.low %vm1058_vm6, %vm1057_vm7  ;;  %v2837_v24 = vpop.f32.mrb[1].mxu0  ;;  %v2843_v28 = vpop.f32.mrb[1].mxu1 }
 0x1b0   : > { %1854 = vmatpush3.bf16.msk.msra.mxu1 %vm1853_vm8, %v2301_v38 }
 0x1b1   : > { %v912_v25 = vpop.permute.xlu1 %911  ;;  %v909_v26 = vpop.permute.xlu0 %908 }
 0x1b2   : > { %vm1044_vm9 = vcmp.eq.s32.totalorder %v2761_v31, %v912_v25  ;;  %vm1043_vm10 = vcmp.eq.s32.totalorder %v2761_v31, %v909_v26  ;;  %v2845_v29 = vpop.f32.mrb[2].mxu0  ;;  %v2852_v34 = vpop.f32.mrb[2].mxu1 }
 0x1b3   : > { %vm1823_vm11 = vmpackc.low %vm1044_vm9, %vm1043_vm10  ;;  %v2848_v30 = vpop.f32.mrb[3].mxu0  ;;  %v2854_v35 = vpop.f32.mrb[3].mxu1 }
 0x1b4   : > { %1824 = vmatprep.subr.msk.bf16.mxu0 %vm1823_vm11, %v2301_v38 }
 0x1b5   : > { %v1008_v32 = vpop.permute.xlu1 %1007  ;;  %v1005_v33 = vpop.permute.xlu0 %1004 }
 0x1b6   : > { %vm1076_vm12 = vcmp.eq.s32.totalorder %v2761_v31, %v1008_v32  ;;  %vm1075_vm13 = vcmp.eq.s32.totalorder %v2761_v31, %v1005_v33  ;;  %v2856_v36 = vpop.f32.mrb[4].mxu0  ;;  %v2863_v41 = vpop.f32.mrb[4].mxu1 }
 0x1b7   : > { %vm1855_vm14 = vmpackc.low %vm1076_vm12, %vm1075_vm13  ;;  %v2859_v37 = vpop.f32.mrb[5].mxu0  ;;  %v2865_v42 = vpop.f32.mrb[5].mxu1 }
 0x1b8   : > { %1856 = vmatprep.subr.msk.bf16.mxu1 %vm1855_vm14, %v2301_v38 }
 0x1b9   : > { %v864_v39 = vpop.permute.xlu1 %863  ;;  %v861_v40 = vpop.permute.xlu0 %860 }
 0x1ba   : > { %vm1028_vm15 = vcmp.eq.s32.totalorder %v2761_v31, %v864_v39  ;;  %vm1027_vm0 = vcmp.eq.s32.totalorder %v2761_v31, %v861_v40  ;;  %v2867_v43 = vpop.f32.mrb[6].mxu0  ;;  %v2875_v48 = vpop.f32.mrb[6].mxu1 }
 0x1bb   : > { %vm1825_vm1 = vmpackc.low %vm1028_vm15, %vm1027_vm0  ;;  %v2870_v44 = vpop.f32.mrb[7].mxu0  ;;  %v2877_v49 = vpop.f32.mrb[7].mxu1 }
 0x1bc   : > { %1826 = vmatpush3.bf16.msk.msra.mxu0 %vm1825_vm1, %v2301_v38 }
 0x1bd   : > { %v960_v45 = vpop.permute.xlu1 %959  ;;  %v957_v46 = vpop.permute.xlu0 %956 }
 0x1be   : > { %vm1060_vm2 = vcmp.eq.s32.totalorder %v2761_v31, %v960_v45  ;;  %vm1059_vm3 = vcmp.eq.s32.totalorder %v2761_v31, %v957_v46  ;;  %v2879_v50 = vpop.f32.mrb[8].mxu0  ;;  %v2886_v55 = vpop.f32.mrb[8].mxu1 }
 0x1bf   : > { %vm1857_vm4 = vmpackc.low %vm1060_vm2, %vm1059_vm3  ;;  %v2882_v51 = vpop.f32.mrb[9].mxu0  ;;  %v2889_v58 = vpop.f32.mrb[9].mxu1 }
 0x1c0   : > { %1858 = vmatpush3.bf16.msk.msra.mxu1 %vm1857_vm4, %v2301_v38 }
 0x1c1   : > { %v918_v52 = vpop.permute.xlu1 %917  ;;  %v915_v53 = vpop.permute.xlu0 %914 }
 0x1c2   : > { %vm1046_vm5 = vcmp.eq.s32.totalorder %v2761_v31, %v918_v52  ;;  %vm1045_vm6 = vcmp.eq.s32.totalorder %v2761_v31, %v915_v53  ;;  %v2891_v59 = vpop.f32.mrb[10].mxu0  ;;  %v2900_v1 = vpop.f32.mrb[10].mxu1 }
 0x1c3   : > { %vm1827_vm7 = vmpackc.low %vm1046_vm5, %vm1045_vm6  ;;  %v2894_v60 = vpop.f32.mrb[11].mxu0  ;;  %v2906_v4 = vpop.f32.mrb[11].mxu1 }
 0x1c4   : > { %1828 = vmatprep.subr.msk.bf16.mxu0 %vm1827_vm7, %v2301_v38 }
 0x1c5   : > { %v1014_v61 = vpop.permute.xlu1 %1013  ;;  %v1011_v62 = vpop.permute.xlu0 %1010 }
 0x1c6   : > { %vm1078_vm8 = vcmp.eq.s32.totalorder %v2761_v31, %v1014_v61  ;;  %vm1077_vm9 = vcmp.eq.s32.totalorder %v2761_v31, %v1011_v62  ;;  %v2908_v5 = vpop.f32.mrb[12].mxu0  ;;  %v2916_v11 = vpop.f32.mrb[12].mxu1 }
 0x1c7   : > { %vm1859_vm10 = vmpackc.low %vm1078_vm8, %vm1077_vm9  ;;  %v2911_v7 = vpop.f32.mrb[13].mxu0  ;;  %v2921_v13 = vpop.f32.mrb[13].mxu1 }
 0x1c8   : > { %1860 = vmatprep.subr.msk.bf16.mxu1 %vm1859_vm10, %v2301_v38 }
 0x1c9   : > { %v867_v8 = vpop.permute.xlu1 %866  ;;  %v716_v9 = vpop.permute.xlu0 %715 }
 0x1ca   : > { %vm755_vm11 = vcmp.eq.s32.totalorder %v716_v9, %v2898_v0  ;;  %vm754_vm12 = vcmp.eq.s32.totalorder %v716_v9, %v2902_v2  ;;  %vm757_vm13 = vcmp.eq.s32.totalorder %v716_v9, %v2904_v3  ;;  %v2923_v14 = vpop.f32.mrb[14].mxu0  ;;  %vm1029_vm14 = vcmp.eq.s32.totalorder %v2761_v31, %v867_v8  ;;  %v2934_v25 = vpop.f32.mrb[14].mxu1 }
 0x1cb   : > { %v787_v12 = vsel %vm755_vm11, 1.0, %v2300_v6  ;;  %v789_v16 = vsel %vm757_vm13, 1.0, %v2300_v6  ;;  %v2927_v17 = vpop.f32.mrb[15].mxu0  ;;  %v786_v21 = vsel %vm754_vm12, 1.0, %v2300_v6  ;;  %vm756_vm15 = vcmp.eq.s32.totalorder %v716_v9, %v2913_v10 }
 0x1cc   : > { %v1144_v15 = vmul.f32 %v787_v12, %v2837_v24  ;;  %v1146_v18 = vmul.f32 %v789_v16, %v2843_v28  ;;  %v2936_v24 = vpop.f32.mrb[15].mxu1  ;;  %v1143_v26 = vmul.f32 %v786_v21, %v2834_v23  ;;  %v788_v28 = vsel %vm756_vm15, 1.0, %v2300_v6 }
 0x1cd   : > { %v963_v19 = vpop.permute.xlu1 %962  ;;  %v870_v20 = vpop.permute.xlu0 %869  ;;  %v1145_v46 = vmul.f32 %v788_v28, %v2841_v27 }
 0x1ce   : > { %vm1030_vm0 = vcmp.eq.s32.totalorder %v2761_v31, %v870_v20  ;;  %1247 = vmatprep.mubr.f32.mxu0 %v1144_v15  ;;  %1352 = vmatprep.mubr.f32.mxu1 %v1146_v18  ;;  %vm1061_vm2 = vcmp.eq.s32.totalorder %v2761_v31, %v963_v19 }
 0x1cf   : > { %vm1829_vm1 = vmpackc.low %vm1030_vm0, %vm1029_vm14 }
 0x1d0   : > { %1830 = vmatpush3.bf16.msk.msra.mxu0 %vm1829_vm1, %v2301_v38 }
 0x1d1   : > { %v719_v32 = vpop.permute.xlu1 %718  ;;  %v966_v33 = vpop.permute.xlu0 %965 }
 0x1d2   : > { %vm1062_vm3 = vcmp.eq.s32.totalorder %v2761_v31, %v966_v33  ;;  %vm758_vm4 = vcmp.eq.s32.totalorder %v719_v32, %v2902_v2  ;;  %vm759_vm5 = vcmp.eq.s32.totalorder %v719_v32, %v2898_v0  ;;  %vm760_vm7 = vcmp.eq.s32.totalorder %v719_v32, %v2913_v10 }
 0x1d3   : > { %vm1861_vm6 = vmpackc.low %vm1062_vm3, %vm1061_vm2  ;;  %v790_v39 = vsel %vm758_vm4, 1.0, %v2300_v6  ;;  %v791_v40 = vsel %vm759_vm5, 1.0, %v2300_v6  ;;  %vm761_vm8 = vcmp.eq.s32.totalorder %v719_v32, %v2904_v3  ;;  %1248 = vmatmul.mubr.f32.vlgmr.msra.gmra.mrb[16].mxu0 %v1143_v26  ;;  %v792_v52 = vsel %vm760_vm7, 1.0, %v2300_v6 }
 0x1d4   : > { %v1147_v23 = vmul.f32 %v790_v39, %v2845_v29  ;;  %v1148_v45 = vmul.f32 %v791_v40, %v2848_v30  ;;  %v793_v31 = vsel %vm761_vm8, 1.0, %v2300_v6  ;;  %1862 = vmatpush3.bf16.msk.msra.mxu1 %vm1861_vm6, %v2301_v38  ;;  %v1149_v27 = vmul.f32 %v792_v52, %v2852_v34 }
 0x1d5   : > { %v722_v47 = vpop.permute.xlu0 %721  ;;  %v1150_v53 = vmul.f32 %v793_v31, %v2854_v35  ;;  %v725_v54 = vpop.permute.xlu1 %724 }
 0x1d6   : > { %vm763_vm9 = vcmp.eq.s32.totalorder %v722_v47, %v2898_v0  ;;  %vm765_vm10 = vcmp.eq.s32.totalorder %v722_v47, %v2904_v3  ;;  %1252 = vmatprep.mubr.f32.mxu0 %v1148_v45  ;;  %vm767_vm11 = vcmp.eq.s32.totalorder %v725_v54, %v2898_v0  ;;  %vm762_vm12 = vcmp.eq.s32.totalorder %v722_v47, %v2902_v2 }
 0x1d7   : > { %v795_v29 = vsel %vm763_vm9, 1.0, %v2300_v6  ;;  %v797_v30 = vsel %vm765_vm10, 1.0, %v2300_v6  ;;  %1253 = vmatmul.mubr.f32.gmra.mrb[18].mxu0 %v1147_v23  ;;  %1353 = vmatmul.mubr.f32.vlgmr.msra.gmra.mrb[16].mxu1 %v1145_v46  ;;  %vm766_vm13 = vcmp.eq.s32.totalorder %v725_v54, %v2902_v2  ;;  %v799_v56 = vsel %vm767_vm11, 1.0, %v2300_v6 }
 0x1d8   : > { %v1152_v38 = vmul.f32 %v795_v29, %v2859_v37  ;;  %1357 = vmatprep.mubr.f32.mxu1 %v1150_v53  ;;  %v1154_v22 = vmul.f32 %v797_v30, %v2865_v42  ;;  %v794_v37 = vsel %vm762_vm12, 1.0, %v2300_v6  ;;  %v798_v42 = vsel %vm766_vm13, 1.0, %v2300_v6 }
 0x1d9   : > { %v728_v35 = vpop.permute.xlu0 %727  ;;  %v731_v57 = vpop.permute.xlu1 %730  ;;  %v1151_v34 = vmul.f32 %v794_v37, %v2856_v36  ;;  %v1156_v61 = vmul.f32 %v799_v56, %v2870_v44  ;;  %vm769_vm15 = vcmp.eq.s32.totalorder %v725_v54, %v2904_v3  ;;  %vm764_vm0 = vcmp.eq.s32.totalorder %v722_v47, %v2913_v10 }
 0x1da   : > { %1257 = vmatprep.mubr.f32.mxu0 %v1152_v38  ;;  %vm771_vm14 = vcmp.eq.s32.totalorder %v728_v35, %v2898_v0  ;;  %vm770_vm1 = vcmp.eq.s32.totalorder %v728_v35, %v2902_v2  ;;  %vm775_vm2 = vcmp.eq.s32.totalorder %v731_v57, %v2898_v0  ;;  %v1155_v63 = vmul.f32 %v798_v42, %v2867_v43 }
 0x1db   : > { %1358 = vmatmul.mubr.f32.gmra.mrb[18].mxu1 %v1149_v27  ;;  %v803_v62 = vsel %vm771_vm14, 1.0, %v2300_v6  ;;  %1258 = vmatmul.mubr.f32.gmra.mrb[20].mxu0 %v1151_v34  ;;  %vm768_vm3 = vcmp.eq.s32.totalorder %v725_v54, %v2913_v10  ;;  %v801_v36 = vsel %vm769_vm15, 1.0, %v2300_v6  ;;  %vm773_vm4 = vcmp.eq.s32.totalorder %v728_v35, %v2904_v3 }
 0x1dc   : > { %1362 = vmatprep.mubr.f32.mxu1 %v1154_v22  ;;  %1262 = vmatprep.mubr.f32.mxu0 %v1156_v61  ;;  %v1160_v44 = vmul.f32 %v803_v62, %v2882_v51  ;;  %v796_v9 = vsel %vm764_vm0, 1.0, %v2300_v6  ;;  %v802_v12 = vsel %vm770_vm1, 1.0, %v2300_v6  ;;  %vm774_vm5 = vcmp.eq.s32.totalorder %v731_v57, %v2902_v2 }
 0x1dd   : > { %v734_v8 = vpop.permute.xlu0 %733  ;;  %v807_v15 = vsel %vm775_vm2, 1.0, %v2300_v6  ;;  %v1153_v43 = vmul.f32 %v796_v9, %v2863_v41  ;;  %v800_v16 = vsel %vm768_vm3, 1.0, %v2300_v6  ;;  %v1158_v18 = vmul.f32 %v801_v36, %v2877_v49  ;;  %v737_v19 = vpop.permute.xlu1 %736  ;;  %v1177_v9 = vld [vmem:[%s2642_s21 + $0x10] sm:$0xff] }
 0x1de   : > { %vm779_vm6 = vcmp.eq.s32.totalorder %v734_v8, %v2898_v0  ;;  %vm772_vm7 = vcmp.eq.s32.totalorder %v728_v35, %v2913_v10  ;;  %v805_v51 = vsel %vm773_vm4, 1.0, %v2300_v6  ;;  %v1159_v20 = vmul.f32 %v802_v12, %v2879_v50 }
 0x1df   : > { %1263 = vmatmul.mubr.f32.gmra.mrb[22].mxu0 %v1155_v63  ;;  %1363 = vmatmul.mubr.f32.gmra.mrb[20].mxu1 %v1153_v43  ;;  %v806_v21 = vsel %vm774_vm5, 1.0, %v2300_v6  ;;  %v1164_v26 = vmul.f32 %v807_v15, %v2894_v60  ;;  %vm777_vm8 = vcmp.eq.s32.totalorder %v731_v57, %v2904_v3  ;;  %v1157_v41 = vmul.f32 %v800_v16, %v2875_v48 }
 0x1e0   : > { %1267 = vmatprep.mubr.f32.mxu0 %v1160_v44  ;;  %1367 = vmatprep.mubr.f32.mxu1 %v1158_v18  ;;  %vm778_vm9 = vcmp.eq.s32.totalorder %v734_v8, %v2902_v2  ;;  %v811_v49 = vsel %vm779_vm6, 1.0, %v2300_v6  ;;  %v1162_v28 = vmul.f32 %v805_v51, %v2889_v58  ;;  %vm783_vm10 = vcmp.eq.s32.totalorder %v737_v19, %v2898_v0 }
 0x1e1   : > { %v804_v50 = vsel %vm772_vm7, 1.0, %v2300_v6  ;;  %v1163_v60 = vmul.f32 %v806_v21, %v2891_v59  ;;  %vm776_vm11 = vcmp.eq.s32.totalorder %v731_v57, %v2913_v10  ;;  %v809_v48 = vsel %vm777_vm8, 1.0, %v2300_v6  ;;  %v1178_v21 = vld [vmem:[%s2642_s21 + $0x18] sm:$0xff] }
 0x1e2   : > { %v810_v32 = vsel %vm778_vm9, 1.0, %v2300_v6  ;;  %v1168_v33 = vmul.f32 %v811_v49, %v2911_v7  ;;  %vm781_vm12 = vcmp.eq.s32.totalorder %v734_v8, %v2904_v3  ;;  %vm782_vm13 = vcmp.eq.s32.totalorder %v737_v19, %v2902_v2 }
 0x1e3   : > { %1268 = vmatmul.mubr.f32.gmra.mrb[24].mxu0 %v1159_v20  ;;  %1368 = vmatmul.mubr.f32.gmra.mrb[22].mxu1 %v1157_v41  ;;  %v815_v58 = vsel %vm783_vm10, 1.0, %v2300_v6  ;;  %v1161_v0 = vmul.f32 %v804_v50, %v2886_v55  ;;  %v808_v59 = vsel %vm776_vm11, 1.0, %v2300_v6  ;;  %v1166_v39 = vmul.f32 %v809_v48, %v2906_v4 }
 0x1e4   : > { %1272 = vmatprep.mubr.f32.mxu0 %v1164_v26  ;;  %1372 = vmatprep.mubr.f32.mxu1 %v1162_v28  ;;  %vm780_vm14 = vcmp.eq.s32.totalorder %v734_v8, %v2913_v10  ;;  %v813_v40 = vsel %vm781_vm12, 1.0, %v2300_v6  ;;  %v1167_v7 = vmul.f32 %v810_v32, %v2908_v5  ;;  %v814_v23 = vsel %vm782_vm13, 1.0, %v2300_v6 }
 0x1e5   : > { %v1172_v2 = vmul.f32 %v815_v58, %v2927_v17  ;;  %vm785_vm15 = vcmp.eq.s32.totalorder %v737_v19, %v2904_v3  ;;  %v1165_v55 = vmul.f32 %v808_v59, %v2900_v1  ;;  %v812_v4 = vsel %vm780_vm14, 1.0, %v2300_v6 }
 0x1e6   : > { %v1170_v45 = vmul.f32 %v813_v40, %v2921_v13  ;;  %v1171_v31 = vmul.f32 %v814_v23, %v2923_v14  ;;  %vm784_vm0 = vcmp.eq.s32.totalorder %v737_v19, %v2913_v10  ;;  %v817_v5 = vsel %vm785_vm15, 1.0, %v2300_v6 }
 0x1e7   : > { %1273 = vmatmul.mubr.f32.gmra.mrb[26].mxu0 %v1163_v60  ;;  %1373 = vmatmul.mubr.f32.gmra.mrb[24].mxu1 %v1161_v0  ;;  %v1169_v3 = vmul.f32 %v812_v4, %v2916_v11  ;;  %v816_v1 = vsel %vm784_vm0, 1.0, %v2300_v6  ;;  %v1174_v17 = vmul.f32 %v817_v5, %v2936_v24  ;;  %v1175_v6 = vld [vmem:[%s2642_s21] sm:$0xff] }
 0x1e8   : > { %1277 = vmatprep.mubr.f32.mxu0 %v1168_v33  ;;  %1377 = vmatprep.mubr.f32.mxu1 %v1166_v39  ;;  %v1173_v13 = vmul.f32 %v816_v1, %v2934_v25  ;;  %v1176_v25 = vld [vmem:[%s2642_s21 + $0x8] sm:$0xff]  ;;  %v1179_v33 = vld [vmem:[%s2642_s21 + $0x20] sm:$0xff] }
 0x1eb   : > { %1278 = vmatmul.mubr.f32.gmra.mrb[28].mxu0 %v1167_v7  ;;  %1378 = vmatmul.mubr.f32.gmra.mrb[26].mxu1 %v1165_v55  ;;  %v1180_v55 = vld [vmem:[%s2642_s21 + $0x28] sm:$0xff] }
 0x1ec   : > { %1282 = vmatprep.mubr.f32.mxu0 %v1172_v2  ;;  %1382 = vmatprep.mubr.f32.mxu1 %v1170_v45 }
 0x1ef   : > { %1283 = vmatmul.mubr.f32.gmra.mrb[30].mxu0 %v1171_v31  ;;  %1383 = vmatmul.mubr.f32.gmra.mrb[28].mxu1 %v1169_v3 }
 0x1f0   : > { %1387 = vmatprep.mubr.f32.mxu1 %v1174_v17 }
 0x1f3   : > { %1388 = vmatmul.mubr.f32.gmra.mrb[30].mxu1 %v1173_v13  ;;  %v1181_v13 = vld [vmem:[%s2642_s21 + $0x30] sm:$0xff] }
 0x2a6   : > { %v1711_v14 = vpop.f32.mrb[16].mxu0 }
 0x2a7   : > { %v1712_v10 = vpop.f32.mrb[17].mxu0 }
 0x2a8   : > { %v1713_v46 = vadd.f32 %v1712_v10, %v1711_v14 }
 0x2aa   : > { %v1714_v47 = vpop.f32.mrb[18].mxu0  ;;  %v1767_v52 = vpop.f32.mrb[16].mxu1 }
 0x2ab   : > { %v1715_v53 = vpop.f32.mrb[19].mxu0  ;;  %v1768_v11 = vpop.f32.mrb[17].mxu1 }
 0x2ac   : > { %v1716_v29 = vadd.f32 %v1715_v53, %v1714_v47  ;;  %v1769_v30 = vadd.f32 %v1768_v11, %v1767_v52  ;;  %v1182_v53 = vld [vmem:[%s2642_s21 + $0x38] sm:$0xff] }
 0x2ae   : > { %v1355_v54 = vadd.f32 %v1769_v30, %v1713_v46  ;;  %v1770_v24 = vpop.f32.mrb[18].mxu1  ;;  %v1717_v37 = vpop.f32.mrb[20].mxu0 }
 0x2af   : > { %v1771_v38 = vpop.f32.mrb[19].mxu1  ;;  %v1718_v57 = vpop.f32.mrb[21].mxu0 }
 0x2b0   : > { %v1393_v27 = vadd.f32 %v1355_v54, %v1175_v6  ;;  %v1772_v22 = vadd.f32 %v1771_v38, %v1770_v24  ;;  %v1719_v34 = vadd.f32 %v1718_v57, %v1717_v37 }
 0x2b2   : > { %1401 = vst [vmem:[%s2642_s21] sm:$0xff] %v1393_v27  ;;  %v1360_v35 = vadd.f32 %v1772_v22, %v1716_v29  ;;  %v1720_v42 = vpop.f32.mrb[22].mxu0  ;;  %v1773_v62 = vpop.f32.mrb[20].mxu1 }
 0x2b3   : > { %v1721_v61 = vpop.f32.mrb[23].mxu0  ;;  %v1774_v36 = vpop.f32.mrb[21].mxu1 }
 0x2b4   : > { %v1394_v56 = vadd.f32 %v1360_v35, %v1176_v25  ;;  %v1722_v63 = vadd.f32 %v1721_v61, %v1720_v42  ;;  %v1775_v8 = vadd.f32 %v1774_v36, %v1773_v62 }
 0x2b6   : > { %1402 = vst [vmem:[%s2642_s21 + $0x8] sm:$0xff] %v1394_v56  ;;  %v1723_v44 = vpop.f32.mrb[24].mxu0  ;;  %v1365_v15 = vadd.f32 %v1775_v8, %v1719_v34  ;;  %v1776_v43 = vpop.f32.mrb[22].mxu1 }
 0x2b7   : > { %v1724_v12 = vpop.f32.mrb[25].mxu0  ;;  %v1777_v18 = vpop.f32.mrb[23].mxu1 }
 0x2b8   : > { %v1725_v16 = vadd.f32 %v1724_v12, %v1723_v44  ;;  %v1395_v51 = vadd.f32 %v1365_v15, %v1177_v9  ;;  %v1778_v19 = vadd.f32 %v1777_v18, %v1776_v43 }
 0x2ba   : > { %v1726_v20 = vpop.f32.mrb[26].mxu0  ;;  %1403 = vst [vmem:[%s2642_s21 + $0x10] sm:$0xff] %v1395_v51  ;;  %v1370_v41 = vadd.f32 %v1778_v19, %v1722_v63  ;;  %v1779_v49 = vpop.f32.mrb[24].mxu1 }
 0x2bb   : > { %v1727_v26 = vpop.f32.mrb[27].mxu0  ;;  %v1780_v50 = vpop.f32.mrb[25].mxu1 }
 0x2bc   : > { %v1728_v28 = vadd.f32 %v1727_v26, %v1726_v20  ;;  %v1396_v60 = vadd.f32 %v1370_v41, %v1178_v21  ;;  %v1781_v48 = vadd.f32 %v1780_v50, %v1779_v49 }
 0x2be   : > { %v1729_v32 = vpop.f32.mrb[28].mxu0  ;;  %1404 = vst [vmem:[%s2642_s21 + $0x18] sm:$0xff] %v1396_v60  ;;  %v1375_v0 = vadd.f32 %v1781_v48, %v1725_v16  ;;  %v1782_v59 = vpop.f32.mrb[26].mxu1 }
 0x2bf   : > { %v1730_v58 = vpop.f32.mrb[29].mxu0  ;;  %v1783_v40 = vpop.f32.mrb[27].mxu1 }
 0x2c0   : > { %v1731_v39 = vadd.f32 %v1730_v58, %v1729_v32  ;;  %v1397_v7 = vadd.f32 %v1375_v0, %v1179_v33  ;;  %v1784_v23 = vadd.f32 %v1783_v40, %v1782_v59 }
 0x2c2   : > { %v1732_v2 = vpop.f32.mrb[30].mxu0  ;;  %1405 = vst [vmem:[%s2642_s21 + $0x20] sm:$0xff] %v1397_v7  ;;  %v1380_v45 = vadd.f32 %v1784_v23, %v1728_v28  ;;  %v1785_v31 = vpop.f32.mrb[28].mxu1 }
 0x2c3   : > { %v1733_v4 = vpop.f32.mrb[31].mxu0  ;;  %v1786_v3 = vpop.f32.mrb[29].mxu1 }
 0x2c4   : > { %v1734_v5 = vadd.f32 %v1733_v4, %v1732_v2  ;;  %v1398_v1 = vadd.f32 %v1380_v45, %v1180_v55  ;;  %v1787_v17 = vadd.f32 %v1786_v3, %v1785_v31 }
 0x2c6   : > { %1406 = vst [vmem:[%s2642_s21 + $0x28] sm:$0xff] %v1398_v1  ;;  %v1385_v14 = vadd.f32 %v1787_v17, %v1731_v39  ;;  %v1788_v10 = vpop.f32.mrb[30].mxu1 }
 0x2c7   : > { %v1789_v46 = vpop.f32.mrb[31].mxu1 }
 0x2c8   : > { %v1399_v47 = vadd.f32 %v1385_v14, %v1181_v13  ;;  %v1790_v52 = vadd.f32 %v1789_v46, %v1788_v10 }
 0x2ca   : > { %1407 = vst [vmem:[%s2642_s21 + $0x30] sm:$0xff] %v1399_v47  ;;  %v1390_v11 = vadd.f32 %v1790_v52, %v1734_v5 }
 0x2cc   : > { %v1400_v29 = vadd.f32 %v1390_v11, %v1182_v53 }
 0x2ce   : > { %1408 = vst [vmem:[%s2642_s21 + $0x38] sm:$0xff] %v1400_v29 }
 0x2cf   : > { %2169 = shalt.err (!%p2166_p5)
}
 0x2d0   : > { %s2170_s25 = scalar_lea.hbm %s3052_s15, 1024  ;;  %s2174_s18 = scalar_lea.hbm %s3193_s11, 2048 }
 0x2d1   : > { %p2171_p8 = scmp.ne.s32.totalorder %s3052_s15, %s2170_s25  ;;  %p2175_p7 = scmp.lt.u32.totalorder %s3052_s15, %s3193_s11 }
 0x2d2   : > { %p2176_p11 = scmp.lt.u32.totalorder %s2174_s18, %s2170_s25  ;;  %p2178_p3 = scmp.lt.u32.totalorder %s2170_s25, %s3052_s15 }
 0x2d3   : > { %p2172_p0 = pnand %p2171_p8, %p3194_p2 }
 0x2d4   : > { %p2177_p1 = por %p2176_p11, %p2175_p7 }
 0x2d5   : > { %p2173_p9 = pneg %p2172_p0 }
 0x2d6   : > { %p2179_p10 = por %p2178_p3, %p2177_p1 }
 0x2d8   : > { %p2180_p13 = pnand %p2179_p10, %p2173_p9 }
 0x2da   : > { %2183 = shalt.err (!%p2180_p13)
}
 0x2db   : > { %s2303_s27 = smov 128   ;;  %s2304_s28 = smov 256  }
 0x2dc   : > { %s2305_s30 = smov 8  }
 0x2dd   : > { %1877 = dma.vmem_to_hbm [thread:$0]  (%p3194_p2), %s3054_s5, 1024, %s3052_s15, %s3059_s7, %s2303_s27, %s2304_s28, %s2305_s30  }
 0x2de PF: > { %s3195_s21 = sld [smem:[#allocation20_spill]]  ;;  %s3196_s24 = sld [smem:[#allocation16_spill]] }
 0x2df   : > { %s3197_s29 = sld [smem:[#allocation22_spill]] }
 0x2e4   : > { %p1905_p4 = scmp.ge.s32.totalorder %s3195_s21, 2  ;;  %s1437_s14 = sand.u32 1, %s3196_s24  }
 0x2e5   : > { %p3198_p6 = scmp.ne.s32.totalorder %s3197_s29, 0  ;;  %s1438_s17 = scalar_lea.sflag [#allocation4], %s1437_s14 }
 0x2e7   : > { %p1897_p12 = pnand %p1905_p4, %p3198_p6 }
 0x2e9   : > { %2241 = dma.done.wait (!%p1897_p12), %s1438_s17, 1024  }
 0x2ea   : > { %2243 = vsyncadd (!%p1897_p12), %s1438_s17, 4294966272  ;;  %s25_s28 = sadd.s32 1, %s3195_s21   ;;  %s3199_s9 = sld [smem:[#allocation17_spill]] }
 0x2eb   : > { %p22_p5 = scmp.ge.s32.totalorder %s25_s28, 6   ;;  %s3200_s23 = sld [smem:[#allocation25_spill]] }
 0x2ec   : > { %s3201_s25 = sld [smem:[#allocation19_spill]]  ;;  %s3202_s5 = sld [smem:[#allocation23_spill]] }
 0x2ed   : > { %s3203_s27 = sld [smem:[#allocation24_spill]]  ;;  %s3204_s18 = smov %s2250_s19 }
 0x2ee   : > { %s3205_s19 = smov %s2254_s20  ;;  %s3206_s20 = smov %s2494_s8 }
 0x2ef   : > { %s3207_s21 = smov %s2262_s22  ;;  %s3209_s24 = smov %s2278_s26 }
 0x2f0   : > { %s3208_s22 = smov %s3199_s9  ;;  %24 = sbr.rel (!%p22_p5) target bundleno = 16 (0x10), region = 121 }
 0x2f2   : > { %s3210_s26 = smov %s3202_s5 }
 0x2f7   :  { %1443 = vsyncpa [#allocation3], 1 }
 0x2f8   :  { %1445 = vsyncpa [#allocation3 + $0x1], 1 }
 0x2f9   :  { %1446 = vsyncpa [#allocation6], 1 }
 0x2fa   :  { %1447 = vsyncpa [#allocation9], 1 }
 0x2fb   :  { %1449 = vsyncpa [#allocation9 + $0x1], 1 }
 0x2fc   :  { %1450 = vsyncpa [#allocation4], 1 }
 0x2fd   :  { %1452 = vsyncpa [#allocation4 + $0x1], 1 }

</bundles_post_ra>
